<compile_context>
chip_gen: v5e
topology: v5e:2x2
jax: 0.10.0
libtpu: 0.0.40
codegen_flags: <defaults>
</compile_context>

<pallas_src>
import math
import numpy as np
import jax
import jax.numpy as jnp
from jax.experimental import pallas as pl
from jax.experimental.pallas import tpu as pltpu  # noqa: F401  (kept for TPU-specific tuning hooks)

# ---- small, module-consistent config ---------------------------------------
NUM_HEADS = 12                    # config.num_attention_heads = 12
HEAD_DIM = 4
HIDDEN = NUM_HEADS * HEAD_DIM     # 48
VOCAB = 64
LQ = 8                            # query sequence length
LF = 8                            # document / encoder sequence length
B = 2                             # batch
NQ = B * LQ                       # 16 flattened query rows
NF = B * LF                       # 16 flattened key/document rows
NPAIR = B * LQ * LF               # 128 flattened (batch, query, key) rows
MASK_NEG = -10000.0               # HF-style extended attention-mask bias
LN_EPS = 1e-12

# lane-dense output slab layout (2 * 128 lanes wide)
SLAB_W = 256
HID_OFF = 0                       # [  0: 48) attention-layer hidden states
ATTN_OFF = HIDDEN                 # [ 48: 64) max-over-heads attention probs (LF used, rest zero)
LOGIT_OFF = 64                    # [ 64:128) cls / MLM logits
VALUE_OFF = 128                   # [128:192) SPLADE value (broadcast along query rows)
                                  # [192:256) zero pad


def _static_operands():
    """Constant 0/1 matrices that turn the per-head attention into plain 2-D matmuls."""
    scale = 1.0 / math.sqrt(HEAD_DIM)
    pool = np.zeros((HIDDEN, HIDDEN), np.float32)     # lane groups of HEAD_DIM -> head column (scaled)
    expand = np.zeros((HIDDEN, HIDDEN), np.float32)   # head column -> its HEAD_DIM lanes
    for h in range(NUM_HEADS):
        for d in range(HEAD_DIM):
            e = h * HEAD_DIM + d
            pool[e, h] = scale
            expand[h, e] = 1.0

    # NQ == NF here, so the three replication-style matrices share one (NPAIR, NQ) shape.
    rq = np.zeros((NPAIR, NQ), np.float32)    # replicate query rows over key positions
    rk = np.zeros((NPAIR, NQ), np.float32)    # replicate key/document rows over query positions
    fone = np.zeros((NPAIR, NQ), np.float32)  # one-hot of key position (cols 0:LF used)
    gsum = np.zeros((NQ, NPAIR), np.float32)  # sum over the LF-row key group of each (b, q)
    r = 0
    for b in range(B):
        for qi in range(LQ):
            for fi in range(LF):
                rq[r, b * LQ + qi] = 1.0
                rk[r, b * LF + fi] = 1.0
                fone[r, fi] = 1.0
                gsum[b * LQ + qi, r] = 1.0
                r += 1
    return pool, expand, np.stack([rq, rk, fone]), gsum


_POOL, _EXPAND, _REPS, _GSUM = _static_operands()


def attention_head_kernel(hs_ref, bias_ref, reps_ref, gsum_ref,
                          w_ref, wcls_ref, vec_ref, out_ref):
    f32 = jnp.float32
    bf16 = jnp.bfloat16

    x = hs_ref[0:NQ, :]                         # (16, 48) query-side hidden states
    fe = hs_ref[NQ:NQ + NF, :]                  # (16, 48) encoder (document) hidden states

    wq = w_ref[0]
    wk = w_ref[1]
    wo = w_ref[2]
    pool = w_ref[3]
    expand = w_ref[4]
    bq = vec_ref[0:1, 0:HIDDEN]
    bk = vec_ref[1:2, 0:HIDDEN]
    bo = vec_ref[2:3, 0:HIDDEN]
    ln_g = vec_ref[3:4, 0:HIDDEN]
    ln_b = vec_ref[4:5, 0:HIDDEN]
    bcls = vec_ref[5:6, :]

    # Q / K projections (value projection skipped: ignore_value_projection=True).
    q = jnp.dot(x.astype(bf16), wq.astype(bf16), preferred_element_type=f32) + bq
    k = jnp.dot(fe.astype(bf16), wk.astype(bf16), preferred_element_type=f32) + bk

    # Replicate q over key positions and k / raw encoder states over query positions
    # so every (batch, query, key) triple is one row of a (128, 48) slab.
    rq = reps_ref[0]                            # (128, 16)
    rk = reps_ref[1]
    fone = reps_ref[2]
    gsum = gsum_ref[...]                        # (16, 128)
    q_rep = jnp.dot(rq, q, preferred_element_type=f32)       # (128, 48)
    k_rep = jnp.dot(rk, k, preferred_element_type=f32)       # (128, 48)
    f_rep = jnp.dot(rk, fe, preferred_element_type=f32)      # (128, 48)

    # Per-head scaled dot products: pool groups of HEAD_DIM lanes into head columns
    # (pool carries the 1/sqrt(head_dim) scale; columns >= NUM_HEADS stay zero).
    s = jnp.dot(q_rep * k_rep, pool, preferred_element_type=f32)   # (128, 48)
    s = s + bias_ref[...]                                          # additive key mask (128, 1)

    # softmax over key positions (groups of LF consecutive rows).
    s3 = s.reshape(NQ, LF, HIDDEN)
    m = jnp.max(s3, axis=1, keepdims=True)
    e = jnp.exp(s3 - m)
    l = jnp.sum(e, axis=1, keepdims=True)
    p = (e / l).reshape(NPAIR, HIDDEN)                             # (128, 48)

    # qf_attentions = max over the 12 real heads, regrouped into (16, 16) (cols >= LF are 0).
    amax = jnp.max(p[:, 0:NUM_HEADS], axis=1, keepdims=True)       # (128, 1)
    attn_blk = jnp.dot(gsum, amax * fone, preferred_element_type=f32)   # (16, 16)

    # context = probs @ raw encoder states (per head), then output dense + residual + LayerNorm.
    p_exp = jnp.dot(p, expand, preferred_element_type=f32)              # (128, 48)
    ctx = jnp.dot(gsum, p_exp * f_rep, preferred_element_type=f32)      # (16, 48)

    attn_out = jnp.dot(ctx.astype(bf16), wo.astype(bf16), preferred_element_type=f32) + bo
    y = attn_out + x
    mu = jnp.mean(y, axis=-1, keepdims=True)
    var = jnp.mean((y - mu) ** 2, axis=-1, keepdims=True)
    yn = (y - mu) * jax.lax.rsqrt(var + LN_EPS) * ln_g + ln_b            # (16, 48)

    # cls / MLM projection + SPLADE value: max_seq(log1p(relu(logits))).
    logits = jnp.dot(yn.astype(bf16), wcls_ref[...].astype(bf16),
                     preferred_element_type=f32) + bcls                  # (16, 64)
    spl = jnp.log1p(jnp.maximum(logits, 0.0))
    vmax = jnp.max(spl.reshape(B, LQ, VOCAB), axis=1, keepdims=True)     # (B, 1, 64)
    v_rows = jnp.broadcast_to(vmax, (B, LQ, VOCAB)).reshape(NQ, VOCAB)   # (16, 64)

    # single lane-dense (16, 256) output slab
    out_ref[:, HID_OFF:HID_OFF + HIDDEN] = yn
    out_ref[:, ATTN_OFF:LOGIT_OFF] = attn_blk
    out_ref[:, LOGIT_OFF:LOGIT_OFF + VOCAB] = logits
    out_ref[:, VALUE_OFF:VALUE_OFF + VOCAB] = v_rows
    out_ref[:, VALUE_OFF + VOCAB:SLAB_W] = jnp.zeros((NQ, SLAB_W - VALUE_OFF - VOCAB), f32)


@jax.jit
def attention_head_forward(q_hidden, f_hidden, f_mask, params):
    """Fused cross-attention + cls + SPLADE-value forward (samples == 1 branch)."""
    wq, bq, wk, bk, wo, bo, ln_g, ln_b, wcls, bcls = params

    # pack both hidden-state tensors into one (32, 48) slab
    hs = jnp.concatenate([q_hidden.reshape(NQ, HIDDEN),
                          f_hidden.reshape(NF, HIDDEN)], axis=0)

    # HF-style additive attention-mask bias, one row per (batch, query, key) triple.
    bias = jnp.where(f_mask > 0.5, 0.0, MASK_NEG).astype(jnp.float32)          # (B, LF)
    bias_rows = jnp.broadcast_to(bias[:, None, :], (B, LQ, LF)).reshape(NPAIR, 1)

    w_stack = jnp.stack([wq, wk, wo, jnp.asarray(_POOL), jnp.asarray(_EXPAND)])  # (5, 48, 48)

    vec = jnp.zeros((8, VOCAB), jnp.float32)
    vec = vec.at[0, :HIDDEN].set(bq.reshape(HIDDEN))
    vec = vec.at[1, :HIDDEN].set(bk.reshape(HIDDEN))
    vec = vec.at[2, :HIDDEN].set(bo.reshape(HIDDEN))
    vec = vec.at[3, :HIDDEN].set(ln_g.reshape(HIDDEN))
    vec = vec.at[4, :HIDDEN].set(ln_b.reshape(HIDDEN))
    vec = vec.at[5, :VOCAB].set(bcls.reshape(VOCAB))

    slab = pl.pallas_call(
        attention_head_kernel,
        out_shape=jax.ShapeDtypeStruct((NQ, SLAB_W), jnp.float32),
    )(hs, bias_rows, jnp.asarray(_REPS), jnp.asarray(_GSUM), w_stack, wcls, vec)

    hid = slab[:, HID_OFF:HID_OFF + HIDDEN].reshape(B, LQ, HIDDEN)        # attn_out[0]
    qf_attn = slab[:, ATTN_OFF:ATTN_OFF + LF].reshape(B, LQ, LF)          # max over heads
    qf_logits = slab[:, LOGIT_OFF:LOGIT_OFF + VOCAB].reshape(B, LQ, VOCAB)
    value = slab[:, VALUE_OFF:VALUE_OFF + VOCAB].reshape(B, LQ, VOCAB)[:, 0, :]   # (B, VOCAB)

    # samples == 1 branch of the PyTorch forward:
    actions = []
    logprobs = [jnp.zeros((B,), jnp.float32)]
    values = [value]
    # TODO(synk): samples > 1 path (OneHotCategorical sampling) not implemented;
    #             the module default is samples=1.
    return {
        "actions": actions,
        "logprobs": logprobs,
        "values": values,
        "output": (hid, qf_attn, qf_logits),
    }


if __name__ == "__main__":
    key = jax.random.PRNGKey(0)
    ks = jax.random.split(key, 12)

    # --- synthetic deterministic parameters ---------------------------------
    wq = 0.02 * jax.random.normal(ks[0], (HIDDEN, HIDDEN), jnp.float32)
    bq = jnp.zeros((1, HIDDEN), jnp.float32)
    wk = 0.02 * jax.random.normal(ks[1], (HIDDEN, HIDDEN), jnp.float32)
    bk = jnp.zeros((1, HIDDEN), jnp.float32)
    wo = 0.02 * jax.random.normal(ks[2], (HIDDEN, HIDDEN), jnp.float32)
    bo = jnp.zeros((1, HIDDEN), jnp.float32)
    ln_g = jnp.ones((1, HIDDEN), jnp.float32)
    ln_b = jnp.zeros((1, HIDDEN), jnp.float32)
    wcls = 0.02 * jax.random.normal(ks[3], (HIDDEN, VOCAB), jnp.float32)
    bcls = jnp.zeros((1, VOCAB), jnp.float32)
    params = (wq, bq, wk, bk, wo, bo, ln_g, ln_b, wcls, bcls)

    # --- inputs --------------------------------------------------------------
    # TODO(synk): the pretrained HF encoder has no clean Pallas equivalent;
    #             stand in with a deterministic embedding lookup (plain JAX glue).
    emb_table = 0.02 * jax.random.normal(ks[4], (VOCAB, HIDDEN), jnp.float32)
    input_ids = jax.random.randint(ks[5], (B, LF), 0, VOCAB)        # document tokens
    attention_mask = jnp.ones((B, LF), jnp.float32).at[1, LF - 2:].set(0.0)
    f_hidden = emb_table[input_ids]                                 # encoder last_hidden_states

    # q_out.last_hidden_states (query-side encoder output)
    q_hidden = 0.02 * jax.random.normal(ks[6], (B, LQ, HIDDEN), jnp.float32)

    out = attention_head_forward(q_hidden, f_hidden, attention_mask, params)
    jax.block_until_ready(out["values"][0])
    jax.block_until_ready(out["output"][0])
    print("KERNEL_OK")
</pallas_src>

<mosaic_0001>
module attributes {stable_mosaic.version = 11 : i64} {
  func.func @attention_head_kernel(%arg0: memref<32x48xf32, #tpu.memory_space<vmem>>, %arg1: memref<128x1xf32, #tpu.memory_space<vmem>>, %arg2: memref<3x128x16xf32, #tpu.memory_space<vmem>>, %arg3: memref<16x128xf32, #tpu.memory_space<vmem>>, %arg4: memref<5x48x48xf32, #tpu.memory_space<vmem>>, %arg5: memref<48x64xf32, #tpu.memory_space<vmem>>, %arg6: memref<8x64xf32, #tpu.memory_space<vmem>>, %arg7: memref<16x256xf32, #tpu.memory_space<vmem>>) attributes {dimension_semantics = [], scalar_prefetch = 0 : i64, scratch_operands = 0 : i64, tpu.core_type = #tpu.core_type<tc>} {
    %c0 = arith.constant 0 : index
    %c0_0 = arith.constant 0 : index
    %0 = vector.load %arg0[%c0, %c0_0] : memref<32x48xf32, #tpu.memory_space<vmem>>, vector<16x48xf32>
    %c16 = arith.constant 16 : index
    %c0_1 = arith.constant 0 : index
    %1 = vector.load %arg0[%c16, %c0_1] : memref<32x48xf32, #tpu.memory_space<vmem>>, vector<16x48xf32>
    %c0_2 = arith.constant 0 : index
    %c0_3 = arith.constant 0 : index
    %c0_4 = arith.constant 0 : index
    %2 = vector.load %arg4[%c0_2, %c0_3, %c0_4] : memref<5x48x48xf32, #tpu.memory_space<vmem>>, vector<1x48x48xf32>
    %3 = vector.shape_cast %2 : vector<1x48x48xf32> to vector<48x48xf32>
    %c1 = arith.constant 1 : index
    %c0_5 = arith.constant 0 : index
    %c0_6 = arith.constant 0 : index
    %4 = vector.load %arg4[%c1, %c0_5, %c0_6] : memref<5x48x48xf32, #tpu.memory_space<vmem>>, vector<1x48x48xf32>
    %5 = vector.shape_cast %4 : vector<1x48x48xf32> to vector<48x48xf32>
    %c2 = arith.constant 2 : index
    %c0_7 = arith.constant 0 : index
    %c0_8 = arith.constant 0 : index
    %6 = vector.load %arg4[%c2, %c0_7, %c0_8] : memref<5x48x48xf32, #tpu.memory_space<vmem>>, vector<1x48x48xf32>
    %7 = vector.shape_cast %6 : vector<1x48x48xf32> to vector<48x48xf32>
    %c3 = arith.constant 3 : index
    %c0_9 = arith.constant 0 : index
    %c0_10 = arith.constant 0 : index
    %8 = vector.load %arg4[%c3, %c0_9, %c0_10] : memref<5x48x48xf32, #tpu.memory_space<vmem>>, vector<1x48x48xf32>
    %9 = vector.shape_cast %8 : vector<1x48x48xf32> to vector<48x48xf32>
    %c4 = arith.constant 4 : index
    %c0_11 = arith.constant 0 : index
    %c0_12 = arith.constant 0 : index
    %10 = vector.load %arg4[%c4, %c0_11, %c0_12] : memref<5x48x48xf32, #tpu.memory_space<vmem>>, vector<1x48x48xf32>
    %11 = vector.shape_cast %10 : vector<1x48x48xf32> to vector<48x48xf32>
    %c0_13 = arith.constant 0 : index
    %c0_14 = arith.constant 0 : index
    %12 = vector.load %arg6[%c0_13, %c0_14] : memref<8x64xf32, #tpu.memory_space<vmem>>, vector<1x48xf32>
    %c1_15 = arith.constant 1 : index
    %c0_16 = arith.constant 0 : index
    %13 = vector.load %arg6[%c1_15, %c0_16] : memref<8x64xf32, #tpu.memory_space<vmem>>, vector<1x48xf32>
    %c2_17 = arith.constant 2 : index
    %c0_18 = arith.constant 0 : index
    %14 = vector.load %arg6[%c2_17, %c0_18] : memref<8x64xf32, #tpu.memory_space<vmem>>, vector<1x48xf32>
    %c3_19 = arith.constant 3 : index
    %c0_20 = arith.constant 0 : index
    %15 = vector.load %arg6[%c3_19, %c0_20] : memref<8x64xf32, #tpu.memory_space<vmem>>, vector<1x48xf32>
    %c4_21 = arith.constant 4 : index
    %c0_22 = arith.constant 0 : index
    %16 = vector.load %arg6[%c4_21, %c0_22] : memref<8x64xf32, #tpu.memory_space<vmem>>, vector<1x48xf32>
    %c5 = arith.constant 5 : index
    %c0_23 = arith.constant 0 : index
    %17 = vector.load %arg6[%c5, %c0_23] : memref<8x64xf32, #tpu.memory_space<vmem>>, vector<1x64xf32>
    %18 = arith.truncf %0 : vector<16x48xf32> to vector<16x48xbf16>
    %19 = arith.truncf %3 : vector<48x48xf32> to vector<48x48xbf16>
    %cst = arith.constant dense<0.000000e+00> : vector<16x48xf32>
    %20 = tpu.matmul %18, %19, %cst {dimension_numbers = #tpu.dot_dimension_numbers<[1], [0], [0], [1], [0, 0, 1, 1], [], []>} : vector<16x48xbf16>, vector<48x48xbf16>, vector<16x48xf32> -> vector<16x48xf32>
    %21 = vector.broadcast %12 : vector<1x48xf32> to vector<16x48xf32>
    %22 = arith.addf %20, %21 : vector<16x48xf32>
    %23 = arith.truncf %1 : vector<16x48xf32> to vector<16x48xbf16>
    %24 = arith.truncf %5 : vector<48x48xf32> to vector<48x48xbf16>
    %cst_24 = arith.constant dense<0.000000e+00> : vector<16x48xf32>
    %25 = tpu.matmul %23, %24, %cst_24 {dimension_numbers = #tpu.dot_dimension_numbers<[1], [0], [0], [1], [0, 0, 1, 1], [], []>} : vector<16x48xbf16>, vector<48x48xbf16>, vector<16x48xf32> -> vector<16x48xf32>
    %26 = vector.broadcast %13 : vector<1x48xf32> to vector<16x48xf32>
    %27 = arith.addf %25, %26 : vector<16x48xf32>
    %c0_25 = arith.constant 0 : index
    %c0_26 = arith.constant 0 : index
    %c0_27 = arith.constant 0 : index
    %28 = vector.load %arg2[%c0_25, %c0_26, %c0_27] : memref<3x128x16xf32, #tpu.memory_space<vmem>>, vector<1x128x16xf32>
    %29 = vector.shape_cast %28 : vector<1x128x16xf32> to vector<128x16xf32>
    %c1_28 = arith.constant 1 : index
    %c0_29 = arith.constant 0 : index
    %c0_30 = arith.constant 0 : index
    %30 = vector.load %arg2[%c1_28, %c0_29, %c0_30] : memref<3x128x16xf32, #tpu.memory_space<vmem>>, vector<1x128x16xf32>
    %31 = vector.shape_cast %30 : vector<1x128x16xf32> to vector<128x16xf32>
    %c2_31 = arith.constant 2 : index
    %c0_32 = arith.constant 0 : index
    %c0_33 = arith.constant 0 : index
    %32 = vector.load %arg2[%c2_31, %c0_32, %c0_33] : memref<3x128x16xf32, #tpu.memory_space<vmem>>, vector<1x128x16xf32>
    %33 = vector.shape_cast %32 : vector<1x128x16xf32> to vector<128x16xf32>
    %c0_34 = arith.constant 0 : index
    %c0_35 = arith.constant 0 : index
    %34 = vector.load %arg3[%c0_34, %c0_35] : memref<16x128xf32, #tpu.memory_space<vmem>>, vector<16x128xf32>
    %cst_36 = arith.constant dense<0.000000e+00> : vector<128x48xf32>
    %35 = tpu.matmul %29, %22, %cst_36 {dimension_numbers = #tpu.dot_dimension_numbers<[1], [0], [0], [1], [0, 0, 1, 1], [], []>} : vector<128x16xf32>, vector<16x48xf32>, vector<128x48xf32> -> vector<128x48xf32>
    %cst_37 = arith.constant dense<0.000000e+00> : vector<128x48xf32>
    %36 = tpu.matmul %31, %27, %cst_37 {dimension_numbers = #tpu.dot_dimension_numbers<[1], [0], [0], [1], [0, 0, 1, 1], [], []>} : vector<128x16xf32>, vector<16x48xf32>, vector<128x48xf32> -> vector<128x48xf32>
    %cst_38 = arith.constant dense<0.000000e+00> : vector<128x48xf32>
    %37 = tpu.matmul %31, %1, %cst_38 {dimension_numbers = #tpu.dot_dimension_numbers<[1], [0], [0], [1], [0, 0, 1, 1], [], []>} : vector<128x16xf32>, vector<16x48xf32>, vector<128x48xf32> -> vector<128x48xf32>
    %38 = arith.mulf %35, %36 : vector<128x48xf32>
    %cst_39 = arith.constant dense<0.000000e+00> : vector<128x48xf32>
    %39 = tpu.matmul %38, %9, %cst_39 {dimension_numbers = #tpu.dot_dimension_numbers<[1], [0], [0], [1], [0, 0, 1, 1], [], []>} : vector<128x48xf32>, vector<48x48xf32>, vector<128x48xf32> -> vector<128x48xf32>
    %c0_40 = arith.constant 0 : index
    %c0_41 = arith.constant 0 : index
    %40 = vector.load %arg1[%c0_40, %c0_41] : memref<128x1xf32, #tpu.memory_space<vmem>>, vector<128x1xf32>
    %41 = vector.broadcast %40 : vector<128x1xf32> to vector<128x48xf32>
    %42 = arith.addf %39, %41 : vector<128x48xf32>
    %43 = vector.shape_cast %42 : vector<128x48xf32> to vector<16x8x48xf32>
    %cst_42 = arith.constant dense<0xFF800000> : vector<16x48xf32>
    %44 = vector.multi_reduction <maximumf>, %43, %cst_42 [1] : vector<16x8x48xf32> to vector<16x48xf32>
    %45 = vector.shape_cast %44 : vector<16x48xf32> to vector<16x1x48xf32>
    %46 = vector.broadcast %45 : vector<16x1x48xf32> to vector<16x8x48xf32>
    %47 = arith.subf %43, %46 : vector<16x8x48xf32>
    %48 = math.exp %47 : vector<16x8x48xf32>
    %cst_43 = arith.constant dense<0.000000e+00> : vector<16x48xf32>
    %49 = vector.multi_reduction <add>, %48, %cst_43 [1] : vector<16x8x48xf32> to vector<16x48xf32>
    %50 = vector.shape_cast %49 : vector<16x48xf32> to vector<16x1x48xf32>
    %51 = vector.broadcast %50 : vector<16x1x48xf32> to vector<16x8x48xf32>
    %52 = arith.divf %48, %51 : vector<16x8x48xf32>
    %53 = vector.shape_cast %52 : vector<16x8x48xf32> to vector<128x48xf32>
    %54 = vector.extract_strided_slice %53 {offsets = [0, 0], sizes = [128, 12], strides = [1, 1]} : vector<128x48xf32> to vector<128x12xf32>
    %cst_44 = arith.constant dense<0xFF800000> : vector<128xf32>
    %55 = vector.multi_reduction <maximumf>, %54, %cst_44 [1] : vector<128x12xf32> to vector<128xf32>
    %56 = vector.shape_cast %55 : vector<128xf32> to vector<128x1xf32>
    %57 = vector.broadcast %56 : vector<128x1xf32> to vector<128x16xf32>
    %58 = arith.mulf %57, %33 : vector<128x16xf32>
    %cst_45 = arith.constant dense<0.000000e+00> : vector<16x16xf32>
    %59 = tpu.matmul %34, %58, %cst_45 {dimension_numbers = #tpu.dot_dimension_numbers<[1], [0], [0], [1], [0, 0, 1, 1], [], []>} : vector<16x128xf32>, vector<128x16xf32>, vector<16x16xf32> -> vector<16x16xf32>
    %cst_46 = arith.constant dense<0.000000e+00> : vector<128x48xf32>
    %60 = tpu.matmul %53, %11, %cst_46 {dimension_numbers = #tpu.dot_dimension_numbers<[1], [0], [0], [1], [0, 0, 1, 1], [], []>} : vector<128x48xf32>, vector<48x48xf32>, vector<128x48xf32> -> vector<128x48xf32>
    %61 = arith.mulf %60, %37 : vector<128x48xf32>
    %cst_47 = arith.constant dense<0.000000e+00> : vector<16x48xf32>
    %62 = tpu.matmul %34, %61, %cst_47 {dimension_numbers = #tpu.dot_dimension_numbers<[1], [0], [0], [1], [0, 0, 1, 1], [], []>} : vector<16x128xf32>, vector<128x48xf32>, vector<16x48xf32> -> vector<16x48xf32>
    %63 = arith.truncf %62 : vector<16x48xf32> to vector<16x48xbf16>
    %64 = arith.truncf %7 : vector<48x48xf32> to vector<48x48xbf16>
    %cst_48 = arith.constant dense<0.000000e+00> : vector<16x48xf32>
    %65 = tpu.matmul %63, %64, %cst_48 {dimension_numbers = #tpu.dot_dimension_numbers<[1], [0], [0], [1], [0, 0, 1, 1], [], []>} : vector<16x48xbf16>, vector<48x48xbf16>, vector<16x48xf32> -> vector<16x48xf32>
    %66 = vector.broadcast %14 : vector<1x48xf32> to vector<16x48xf32>
    %67 = arith.addf %65, %66 : vector<16x48xf32>
    %68 = arith.addf %67, %0 : vector<16x48xf32>
    %cst_49 = arith.constant dense<0.000000e+00> : vector<16xf32>
    %69 = vector.multi_reduction <add>, %68, %cst_49 [1] : vector<16x48xf32> to vector<16xf32>
    %70 = vector.shape_cast %69 : vector<16xf32> to vector<16x1xf32>
    %cst_50 = arith.constant 4.800000e+01 : f32
    %71 = vector.broadcast %cst_50 : f32 to vector<16x1xf32>
    %72 = arith.divf %70, %71 : vector<16x1xf32>
    %73 = vector.broadcast %72 : vector<16x1xf32> to vector<16x48xf32>
    %74 = arith.subf %68, %73 : vector<16x48xf32>
    %75 = arith.mulf %74, %74 : vector<16x48xf32>
    %cst_51 = arith.constant dense<0.000000e+00> : vector<16xf32>
    %76 = vector.multi_reduction <add>, %75, %cst_51 [1] : vector<16x48xf32> to vector<16xf32>
    %77 = vector.shape_cast %76 : vector<16xf32> to vector<16x1xf32>
    %cst_52 = arith.constant 4.800000e+01 : f32
    %78 = vector.broadcast %cst_52 : f32 to vector<16x1xf32>
    %79 = arith.divf %77, %78 : vector<16x1xf32>
    %80 = vector.broadcast %72 : vector<16x1xf32> to vector<16x48xf32>
    %81 = arith.subf %68, %80 : vector<16x48xf32>
    %cst_53 = arith.constant 9.99999996E-13 : f32
    %82 = vector.broadcast %cst_53 : f32 to vector<16x1xf32>
    %83 = arith.addf %79, %82 : vector<16x1xf32>
    %84 = math.rsqrt %83 : vector<16x1xf32>
    %85 = vector.broadcast %84 : vector<16x1xf32> to vector<16x48xf32>
    %86 = arith.mulf %81, %85 : vector<16x48xf32>
    %87 = vector.broadcast %15 : vector<1x48xf32> to vector<16x48xf32>
    %88 = arith.mulf %86, %87 : vector<16x48xf32>
    %89 = vector.broadcast %16 : vector<1x48xf32> to vector<16x48xf32>
    %90 = arith.addf %88, %89 : vector<16x48xf32>
    %91 = arith.truncf %90 : vector<16x48xf32> to vector<16x48xbf16>
    %c0_54 = arith.constant 0 : index
    %c0_55 = arith.constant 0 : index
    %92 = vector.load %arg5[%c0_54, %c0_55] : memref<48x64xf32, #tpu.memory_space<vmem>>, vector<48x64xf32>
    %93 = arith.truncf %92 : vector<48x64xf32> to vector<48x64xbf16>
    %cst_56 = arith.constant dense<0.000000e+00> : vector<16x64xf32>
    %94 = tpu.matmul %91, %93, %cst_56 {dimension_numbers = #tpu.dot_dimension_numbers<[1], [0], [0], [1], [0, 0, 1, 1], [], []>} : vector<16x48xbf16>, vector<48x64xbf16>, vector<16x64xf32> -> vector<16x64xf32>
    %95 = vector.broadcast %17 : vector<1x64xf32> to vector<16x64xf32>
    %96 = arith.addf %94, %95 : vector<16x64xf32>
    %cst_57 = arith.constant 0.000000e+00 : f32
    %97 = vector.broadcast %cst_57 : f32 to vector<16x64xf32>
    %98 = arith.maximumf %96, %97 : vector<16x64xf32>
    %99 = math.log1p %98 : vector<16x64xf32>
    %100 = vector.shape_cast %99 : vector<16x64xf32> to vector<2x8x64xf32>
    %cst_58 = arith.constant dense<0xFF800000> : vector<2x64xf32>
    %101 = vector.multi_reduction <maximumf>, %100, %cst_58 [1] : vector<2x8x64xf32> to vector<2x64xf32>
    %102 = vector.shape_cast %101 : vector<2x64xf32> to vector<2x1x64xf32>
    %103 = vector.shape_cast %102 : vector<2x1x64xf32> to vector<2x1x64xf32>
    %104 = vector.broadcast %103 : vector<2x1x64xf32> to vector<2x8x64xf32>
    %105 = vector.shape_cast %104 : vector<2x8x64xf32> to vector<16x64xf32>
    %c0_59 = arith.constant 0 : index
    %c0_60 = arith.constant 0 : index
    %106 = vector.load %arg7[%c0_59, %c0_60] : memref<16x256xf32, #tpu.memory_space<vmem>>, vector<16x48xf32>
    tpu.vector_store %arg7[%c0_59, %c0_60], %90 {strides = array<i32>} : memref<16x256xf32, #tpu.memory_space<vmem>>, vector<16x48xf32>,
    %c0_61 = arith.constant 0 : index
    %c48 = arith.constant 48 : index
    %107 = vector.load %arg7[%c0_61, %c48] : memref<16x256xf32, #tpu.memory_space<vmem>>, vector<16x16xf32>
    tpu.vector_store %arg7[%c0_61, %c48], %59 {strides = array<i32>} : memref<16x256xf32, #tpu.memory_space<vmem>>, vector<16x16xf32>,
    %c0_62 = arith.constant 0 : index
    %c64 = arith.constant 64 : index
    %108 = vector.load %arg7[%c0_62, %c64] : memref<16x256xf32, #tpu.memory_space<vmem>>, vector<16x64xf32>
    tpu.vector_store %arg7[%c0_62, %c64], %96 {strides = array<i32>} : memref<16x256xf32, #tpu.memory_space<vmem>>, vector<16x64xf32>,
    %c0_63 = arith.constant 0 : index
    %c128 = arith.constant 128 : index
    %109 = vector.load %arg7[%c0_63, %c128] : memref<16x256xf32, #tpu.memory_space<vmem>>, vector<16x64xf32>
    tpu.vector_store %arg7[%c0_63, %c128], %105 {strides = array<i32>} : memref<16x256xf32, #tpu.memory_space<vmem>>, vector<16x64xf32>,
    %cst_64 = arith.constant 0.000000e+00 : f32
    %110 = vector.broadcast %cst_64 : f32 to vector<16x64xf32>
    %c0_65 = arith.constant 0 : index
    %c192 = arith.constant 192 : index
    %111 = vector.load %arg7[%c0_65, %c192] : memref<16x256xf32, #tpu.memory_space<vmem>>, vector<16x64xf32>
    tpu.vector_store %arg7[%c0_65, %c192], %110 {strides = array<i32>} : memref<16x256xf32, #tpu.memory_space<vmem>>, vector<16x64xf32>,
    return
  }
}

</mosaic_0001>

<bundles_post_ra>
// kernel: attention_head_forward.1
= control target key start
LH: loop header
LB: loop body
LE: loop exit
PB: predicated region body
PF: predicated region fallthrough
CT: control target
= control target key end

     0   :  { %12 = vsyncpa [#allocation3], 0  ;;  %s1861_s27 = smov [#allocation2]   ;;  %s1862_s29 = smov 128   ;;  %s2720_s0 = inlined_call_operand.vmem [shape: f32[32,48], index: 0, kind: input, shape index: {}]   ;;  %s2721_s1 = inlined_call_operand.vmem [shape: f32[128,1], index: 1, kind: input, shape index: {}]   ;;  %s2722_s2 = inlined_call_operand.hbm [shape: f32[3,128,16], index: 2, kind: input, shape index: {}]   ;;  %s2723_s3 = inlined_call_operand.vmem [shape: f32[16,128], index: 3, kind: input, shape index: {}]   ;;  %s2724_s4 = inlined_call_operand.vmem [shape: f32[5,48,48], index: 4, kind: input, shape index: {}]   ;;  %s2725_s5 = inlined_call_operand.vmem [shape: f32[48,64], index: 5, kind: input, shape index: {}]   ;;  %s2726_s6 = inlined_call_operand.vmem [shape: f32[8,64], index: 6, kind: input, shape index: {}]   ;;  %s2727_s7 = inlined_call_operand.vmem [shape: f32[16,256], index: 7, kind: output, shape index: {}]  }
   0x1   :  { %s21_s26 = sshll.u32 %s2722_s2, 4  ;;  %s23_s28 = sshll.u32 %s1861_s27, 4  ;;  %s22_s26 = int_to_ptr.hbm [resolvable:$true] %s21_s26  ;;  %s24_s28 = int_to_ptr.vmem [resolvable:$true] %s23_s28 }
   0x2   :  { %s1863_s30 = smov 8  }
   0x3   :  { %29 = dma.hbm_to_vmem [thread:$0]  %s22_s26, 6144, %s24_s28, [#allocation3], %s1862_s29, %s1862_s29, %s1863_s30  }
   0x4   :  { %1859 = dma.done.wait [#allocation3], 6144  }
   0x5   :  { %1860 = vsyncadd [#allocation3], 4294961152  ;;  %v51_v0 = vld [vmem:[%s2724_s4 + $0x20] sm:$0xff]  ;;  %v52_v1 = vld [vmem:[%s2724_s4 + $0x28] sm:$0xff]  ;;  %vm92_vm0 = vcmask 392192   ;;  %vm184_vm1 = vcmask 130048  }
   0x6   :  { %v49_v2 = vld [vmem:[%s2724_s4 + $0x10] sm:$0xff]  ;;  %v90_v3 = vpack.c.bf16 %v52_v1, %v51_v0  ;;  %v50_v4 = vld [vmem:[%s2724_s4 + $0x18] sm:$0xff]  ;;  %v47_v6 = vld [vmem:[%s2724_s4] sm:$0xff]  ;;  %s1865_s21 = smov 48  }
   0x7   :  { %v89_v5 = vpack.c.bf16 %v50_v4, %v49_v2  ;;  %v48_v7 = vld [vmem:[%s2724_s4 + $0x8] sm:$0xff]  ;;  %v43_v8 = vld [vmem:[%s2720_s0] sm:$0xff]  ;;  %v1634_v9 = vld [vmem:[%s2724_s4 + $0x50] sm:$0xff] }
   0x8   :  { %101 = vmatpush.bf16.msra.mxu1 %v90_v3  ;;  %v1635_v10 = vld [vmem:[%s2724_s4 + $0x58] sm:$0xff]  ;;  %v88_v11 = vpack.c.bf16 %v48_v7, %v47_v6  ;;  %v44_v12 = vld [vmem:[%s2720_s0 + $0x8] sm:$0xff]  ;;  %v1632_v14 = vld [vmem:[%s2724_s4 + $0x40] sm:$0xff] }
   0x9   :  { %v113_v13 = vpack.c.bf16 %v1635_v10, %v1634_v9  ;;  %v1633_v15 = vld [vmem:[%s2724_s4 + $0x48] sm:$0xff]  ;;  %v87_v16 = vpack.c.bf16 %v44_v12, %v43_v8  ;;  %v1630_v18 = vld [vmem:[%s2724_s4 + $0x30] sm:$0xff]  ;;  %v1631_v19 = vld [vmem:[%s2724_s4 + $0x38] sm:$0xff]  ;;  %v1864_v8 = vmov 0  }
   0xa   :  { %v112_v17 = vpack.c.bf16 %v1633_v15, %v1632_v14  ;;  %v111_v20 = vpack.c.bf16 %v1631_v19, %v1630_v18  ;;  %v45_v21 = vld [vmem:[%s2720_s0 + $0x10] sm:$0xff]  ;;  %v46_v22 = vld [vmem:[%s2720_s0 + $0x18] sm:$0xff]  ;;  %v1753_v25 = vld [vmem:[%s2726_s6] ss:$0 sm:$0xff]  ;;  %1750 = vset.pattern.permute.xlu0 %v1864_v8  ;;  %1751 = vset.pattern.permute.xlu1 %v1864_v8 }
   0xb   :  { %v110_v23 = vpack.c.bf16 %v46_v22, %v45_v21  ;;  %v136_v29 = vld [vmem:[#allocation2 + $0x20] sm:$0xff]  ;;  %v137_v31 = vld [vmem:[#allocation2 + $0x28] sm:$0xff]  ;;  %v138_v36 = vld [vmem:[#allocation2 + $0x30] sm:$0xff]  ;;  %1752 = vset.pattern.permute.xlu2 %v1864_v8 }
   0xc   :  { %102 = vmatpush.bf16.msra.mxu1 %v89_v5  ;;  %v1754_v32 = vld [vmem:[%s2726_s6 + $0x1] ss:$0 sm:$0xff]  ;;  %v139_v38 = vld [vmem:[#allocation2 + $0x38] sm:$0xff]  ;;  %v1975_v39 = vld [vmem:[#allocation2 + $0xc8] sm:$0xff] }
   0xd   :  { %v1970_v37 = vld [vmem:[#allocation2 + $0xc0] sm:$0xff]  ;;  %v1980_v41 = vld [vmem:[#allocation2 + $0xd0] sm:$0xff]  ;;  %v141_v42 = vld [vmem:[#allocation2 + $0x48] sm:$0xff] }
   0xe   :  { %v140_v40 = vld [vmem:[#allocation2 + $0x40] sm:$0xff]  ;;  %v1985_v43 = vld [vmem:[#allocation2 + $0xd8] sm:$0xff]  ;;  %v142_v44 = vld [vmem:[#allocation2 + $0x50] sm:$0xff] }
   0xf   :  { %v1990_v45 = vld [vmem:[#allocation2 + $0xe0] sm:$0xff]  ;;  %v143_v46 = vld [vmem:[#allocation2 + $0x58] sm:$0xff]  ;;  %v1995_v47 = vld [vmem:[#allocation2 + $0xe8] sm:$0xff] }
  0x10   :  { %103 = vmatpush.bf16.msra.mxu1 %v88_v11  ;;  %v144_v48 = vld [vmem:[#allocation2 + $0x60] sm:$0xff]  ;;  %v2000_v49 = vld [vmem:[#allocation2 + $0xf0] sm:$0xff]  ;;  %v145_v51 = vld [vmem:[#allocation2 + $0x68] sm:$0xff] }
  0x11   :  { %v132_v50 = vld [vmem:[#allocation2] sm:$0xff]  ;;  %v2006_v52 = vld [vmem:[#allocation2 + $0xf8] sm:$0xff]  ;;  %v133_v53 = vld [vmem:[#allocation2 + $0x8] sm:$0xff] }
  0x12   :  { %v146_v54 = vld [vmem:[#allocation2 + $0x70] sm:$0xff]  ;;  %v147_v56 = vld [vmem:[#allocation2 + $0x78] sm:$0xff]  ;;  %v149_v58 = vld [vmem:[#allocation2 + $0x80] sm:$0xff] }
  0x13   :  { %1654 = vmatmul.msk.bf16.vlgmr.msra.gmra.mxu1 %vm92_vm0, %v87_v16  ;;  %v134_v55 = vld [vmem:[#allocation2 + $0x10] sm:$0xff]  ;;  %v135_v57 = vld [vmem:[#allocation2 + $0x18] sm:$0xff]  ;;  %v150_v59 = vld [vmem:[#allocation2 + $0x88] sm:$0xff] }
  0x14   :  { %123 = vmatpush.bf16.msrb.mxu1 %v113_v13  ;;  %v151_v60 = vld [vmem:[#allocation2 + $0x90] sm:$0xff]  ;;  %v152_v61 = vld [vmem:[#allocation2 + $0x98] sm:$0xff]  ;;  %v153_v62 = vld [vmem:[#allocation2 + $0xa0] sm:$0xff] }
  0x15   :  { %v154_v0 = vld [vmem:[#allocation2 + $0xa8] sm:$0xff]  ;;  %v155_v2 = vld [vmem:[#allocation2 + $0xb0] sm:$0xff]  ;;  %v156_v4 = vld [vmem:[#allocation2 + $0xb8] sm:$0xff] }
  0x16   :  { %v492_v7 = vld [vmem:[%s2721_s1] sm:$0xff]  ;;  %v493_v10 = vld [vmem:[%s2721_s1 + $0x8] sm:$0xff]  ;;  %v498_v12 = vld [vmem:[%s2721_s1 + $0x30] sm:$0xff] }
  0x17   :  { %510 = vperm.xlu0 %1750, %v492_v7   ;;  %v1647_v13 = vld [vmem:[%s2724_s4 + $0xb8] sm:$0xff]  ;;  %v1646_v15 = vld [vmem:[%s2724_s4 + $0xb0] sm:$0xff]  ;;  %v1645_v16 = vld [vmem:[%s2724_s4 + $0xa8] sm:$0xff] }
  0x18   :  { %124 = vmatpush.bf16.msrb.mxu1 %v112_v17  ;;  %v494_v17 = vld [vmem:[%s2721_s1 + $0x10] sm:$0xff]  ;;  %v501_v18 = vld [vmem:[%s2721_s1 + $0x48] sm:$0xff]  ;;  %v1644_v19 = vld [vmem:[%s2724_s4 + $0xa0] sm:$0xff] }
  0x19   :  { %520 = vperm.xlu1 %1751, %v494_v17  }
  0x1c   :  { %125 = vmatpush.bf16.msrb.mxu1 %v111_v20  ;;  %v1643_v20 = vld [vmem:[%s2724_s4 + $0x98] sm:$0xff] }
  0x1f   :  { %515 = vperm.xlu0 %1750, %v493_v10  }
  0x20   :  { %646 = vmatpush.msra.mxu1 %v1647_v13 }
  0x22   :  { %647 = vmatpush.msra.mxu1 %v1646_v15 }
  0x23   :  { %1655 = vmatmul.msk.bf16.vlgmr.msrb.gmra.mxu1 %vm92_vm0, %v110_v23  ;;  %v495_v23 = vld [vmem:[%s2721_s1 + $0x18] sm:$0xff] }
  0x24   :  { %648 = vmatpush.msra.mxu1 %v1645_v16  ;;  %525 = vperm.xlu1 %1751, %v495_v23  }
  0x26   :  { %649 = vmatpush.msra.mxu1 %v1644_v19 }
  0x27   :  { %540 = vperm.xlu0 %1750, %v498_v12  }
  0x28   :  { %650 = vmatpush.msra.mxu1 %v1643_v20 }
  0x2f   :  { %555 = vperm.xlu0 %1750, %v501_v18  }
  0x8b   :  { %v521_v23 = vpop.permute.xlu1 %520 }
  0x90   :  { %v105_v24 = vpop.f32.mrf.mxu1 }
  0x91   :  { %v106_v28 = vadd.f32 %v1753_v25, %v105_v24  ;;  %v504_v24 = vld [vmem:[%s2721_s1 + $0x60] sm:$0xff] }
  0x92   :  { %570 = vperm.xlu0 %1750, %v504_v24  }
  0x98   :  { %v107_v26 = vpop.f32.mrf.mxu1 }
  0x99   :  { %v108_v27 = vadd.f32 %v1753_v25, %v107_v26  ;;  %v499_v26 = vld [vmem:[%s2721_s1 + $0x38] sm:$0xff] }
  0x9a   :  { %545 = vperm.xlu1 %1751, %v499_v26  }
  0x9b   :  { %247 = vmatpush.msra.mxu0 %v108_v27  ;;  %1738 = vmatpush.msra.mxu2 %v108_v27  ;;  %v507_v27 = vld [vmem:[%s2721_s1 + $0x78] sm:$0xff] }
  0x9c   :  { %585 = vperm.xlu0 %1750, %v507_v27  }
  0x9d   :  { %248 = vmatpush.msra.mxu0 %v106_v28  ;;  %1739 = vmatpush.msra.mxu2 %v106_v28 }
  0x9e   :  { %1660 = vmatmul.msk.f32.vlgmr.msra.gmra.mxu2 %vm184_vm1, %v136_v29  ;;  %1656 = vmatmul.msk.f32.vlgmr.msra.gmra.mxu0 %vm184_vm1, %v132_v50  ;;  %v502_v29 = vld [vmem:[%s2721_s1 + $0x50] sm:$0xff] }
  0x9f   :  { %425 = vmatpush.msrb.mxu0 %v46_v22  ;;  %v1642_v22 = vld [vmem:[%s2724_s4 + $0x90] sm:$0xff] }
  0xa0   :  { %v127_v30 = vpop.f32.mrf.mxu1  ;;  %651 = vmatpush.msra.mxu1 %v1642_v22  ;;  %v506_v50 = vld [vmem:[%s2721_s1 + $0x70] sm:$0xff] }
  0xa1   :  { %426 = vmatpush.msrb.mxu0 %v45_v21  ;;  %v128_v34 = vadd.f32 %v1754_v32, %v127_v30 }
  0xa2   :  { %560 = vperm.xlu1 %1751, %v502_v29   ;;  %v1653_v29 = vld [vmem:[%s2724_s4 + $0xe8] sm:$0xff] }
  0xa6   :  { %1661 = vmatmul.msk.f32.gmra.mxu2 %vm184_vm1, %v137_v31  ;;  %1657 = vmatmul.msk.f32.gmra.mxu0 %vm184_vm1, %v133_v53 }
  0xa8   :  { %v129_v33 = vpop.f32.mrf.mxu1 }
  0xa9   :  { %v130_v35 = vadd.f32 %v1754_v32, %v129_v33  ;;  %v505_v32 = vld [vmem:[%s2721_s1 + $0x68] sm:$0xff] }
  0xaa   :  { %575 = vperm.xlu1 %1751, %v505_v32  }
  0xab   :  { %1740 = vmatpush.msra.mxu3 %v130_v35  ;;  %360 = vmatpush.msrb.mxu2 %v130_v35 }
  0xad   :  { %1741 = vmatpush.msra.mxu3 %v128_v34  ;;  %361 = vmatpush.msrb.mxu2 %v128_v34 }
  0xae   :  { %1662 = vmatmul.msk.f32.gmra.mxu2 %vm184_vm1, %v138_v36  ;;  %1680 = vmatmul.msk.f32.vlgmr.msra.gmra.mxu3 %vm184_vm1, %v1970_v37  ;;  %v496_v36 = vld [vmem:[%s2721_s1 + $0x20] sm:$0xff] }
  0xaf   :  { %1658 = vmatmul.msk.f32.gmra.mxu0 %vm184_vm1, %v134_v55  ;;  %530 = vperm.xlu2 %1752, %v496_v36  }
  0xb0   :  { %1359 = vmatpush.msrb.mxu3 %v1653_v29 }
  0xb6   :  { %1663 = vmatmul.msk.f32.gmra.mxu2 %vm184_vm1, %v139_v38  ;;  %1681 = vmatmul.msk.f32.gmra.mxu3 %vm184_vm1, %v1975_v39 }
  0xb7   :  { %1659 = vmatmul.msk.f32.gmra.mxu0 %vm184_vm1, %v135_v57 }
  0xbe   :  { %1664 = vmatmul.msk.f32.gmra.mxu2 %vm184_vm1, %v140_v40  ;;  %1682 = vmatmul.msk.f32.gmra.mxu3 %vm184_vm1, %v1980_v41 }
  0xbf   :  { %1688 = vmatmul.msk.f32.vlgmr.msrb.gmra.mxu0 %vm184_vm1, %v149_v58 }
  0xc6   :  { %1665 = vmatmul.msk.f32.gmra.mxu2 %vm184_vm1, %v141_v42  ;;  %1683 = vmatmul.msk.f32.gmra.mxu3 %vm184_vm1, %v1985_v43 }
  0xc7   :  { %1689 = vmatmul.msk.f32.gmra.mxu0 %vm184_vm1, %v150_v59 }
  0xce   :  { %1666 = vmatmul.msk.f32.gmra.mxu2 %vm184_vm1, %v142_v44  ;;  %1684 = vmatmul.msk.f32.gmra.mxu3 %vm184_vm1, %v1990_v45 }
  0xcf   :  { %1690 = vmatmul.msk.f32.gmra.mxu0 %vm184_vm1, %v151_v60 }
  0xd6   :  { %1667 = vmatmul.msk.f32.gmra.mxu2 %vm184_vm1, %v143_v46  ;;  %1685 = vmatmul.msk.f32.gmra.mxu3 %vm184_vm1, %v1995_v47 }
  0xd7   :  { %1691 = vmatmul.msk.f32.gmra.mxu0 %vm184_vm1, %v152_v61 }
  0xde   :  { %1668 = vmatmul.msk.f32.gmra.mxu2 %vm184_vm1, %v144_v48  ;;  %1686 = vmatmul.msk.f32.gmra.mxu3 %vm184_vm1, %v2000_v49 }
  0xdf   :  { %1692 = vmatmul.msk.f32.gmra.mxu0 %vm184_vm1, %v153_v62 }
  0xe6   :  { %1669 = vmatmul.msk.f32.gmra.mxu2 %vm184_vm1, %v145_v51  ;;  %1687 = vmatmul.msk.f32.gmra.mxu3 %vm184_vm1, %v2006_v52 }
  0xe7   :  { %1693 = vmatmul.msk.f32.gmra.mxu0 %vm184_vm1, %v154_v0 }
  0xee   :  { %1670 = vmatmul.msk.f32.gmra.mxu2 %vm184_vm1, %v146_v54 }
  0xef   :  { %1694 = vmatmul.msk.f32.gmra.mxu0 %vm184_vm1, %v155_v2 }
  0xf6   :  { %1671 = vmatmul.msk.f32.gmra.mxu2 %vm184_vm1, %v147_v56 }
  0xf7   :  { %1695 = vmatmul.msk.f32.gmra.mxu0 %vm184_vm1, %v156_v4 }
  0xfe   :  { %1672 = vmatmul.msk.f32.vlgmr.msrb.gmra.mxu2 %vm184_vm1, %v149_v58 }
  0xff   :  { %1696 = vmatmul.msk.f32.gmra.mxu0 %vm184_vm1, %v1970_v37 }
 0x106   :  { %1673 = vmatmul.msk.f32.gmra.mxu2 %vm184_vm1, %v150_v59 }
 0x107   :  { %1697 = vmatmul.msk.f32.gmra.mxu0 %vm184_vm1, %v1975_v39  ;;  %v497_v39 = vld [vmem:[%s2721_s1 + $0x28] sm:$0xff] }
 0x108   :  { %535 = vperm.xlu2 %1752, %v497_v39  }
 0x10e   :  { %1674 = vmatmul.msk.f32.gmra.mxu2 %vm184_vm1, %v151_v60 }
 0x10f   :  { %1698 = vmatmul.msk.f32.gmra.mxu0 %vm184_vm1, %v1980_v41 }
 0x116   :  { %1675 = vmatmul.msk.f32.gmra.mxu2 %vm184_vm1, %v152_v61 }
 0x117   :  { %1699 = vmatmul.msk.f32.gmra.mxu0 %vm184_vm1, %v1985_v43  ;;  %v500_v43 = vld [vmem:[%s2721_s1 + $0x40] sm:$0xff] }
 0x118   :  { %550 = vperm.xlu2 %1752, %v500_v43  }
 0x11b   :  { %v250_v31 = vpop.f32.mrf.mxu0 }
 0x11e   :  { %1676 = vmatmul.msk.f32.gmra.mxu2 %vm184_vm1, %v153_v62 }
 0x11f   :  { %1700 = vmatmul.msk.f32.gmra.mxu0 %vm184_vm1, %v1990_v45 }
 0x121   :  { %v2026_v63 = vpop.f32.mrf.mxu2 }
 0x123   :  { %v253_v35 = vpop.f32.mrf.mxu0 }
 0x126   :  { %1677 = vmatmul.msk.f32.gmra.mxu2 %vm184_vm1, %v154_v0 }
 0x127   :  { %1701 = vmatmul.msk.f32.gmra.mxu0 %vm184_vm1, %v1995_v47  ;;  %v503_v47 = vld [vmem:[%s2721_s1 + $0x58] sm:$0xff] }
 0x128   :  { %565 = vperm.xlu2 %1752, %v503_v47  }
 0x129   :  { %v2030_v1 = vpop.f32.mrf.mxu2 }
 0x12c   :  { %v256_v40 = vpop.f32.mrf.mxu0 }
 0x12e   :  { %1678 = vmatmul.msk.f32.gmra.mxu2 %vm184_vm1, %v155_v2 }
 0x12f   :  { %1702 = vmatmul.msk.f32.gmra.mxu0 %vm184_vm1, %v2000_v49 }
 0x130   :  { %580 = vperm.xlu2 %1752, %v506_v50   ;;  %v1648_v50 = vld [vmem:[%s2724_s4 + $0xc0] sm:$0xff] }
 0x131   :  { %v2034_v3 = vpop.f32.mrf.mxu2  ;;  %v387_v53 = vpop.f32.mrf.mxu3 }
 0x134   :  { %v259_v44 = vpop.f32.mrf.mxu0 }
 0x136   :  { %1679 = vmatmul.msk.f32.gmra.mxu2 %vm184_vm1, %v156_v4 }
 0x137   :  { %1703 = vmatmul.msk.f32.gmra.mxu0 %vm184_vm1, %v2006_v52 }
 0x139   :  { %v2038_v5 = vpop.f32.mrf.mxu2  ;;  %v390_v58 = vpop.f32.mrf.mxu3 }
 0x141   :  { %v2042_v6 = vpop.f32.mrf.mxu2  ;;  %v393_v60 = vpop.f32.mrf.mxu3 }
 0x142   :  { %v484_v59 = vmul.f32 %v387_v53, %v2042_v6 }
 0x149   :  { %v2049_v9 = vpop.f32.mrf.mxu2  ;;  %v396_v62 = vpop.f32.mrf.mxu3 }
 0x14a   :  { %v485_v61 = vmul.f32 %v390_v58, %v2049_v9  ;;  %v511_v9 = vpop.permute.xlu0 %510 }
 0x151   :  { %v2056_v11 = vpop.f32.mrf.mxu2  ;;  %v399_v0 = vpop.f32.mrf.mxu3 }
 0x152   :  { %v516_v15 = vpop.permute.xlu0 %515 }
 0x159   :  { %v2066_v14 = vpop.f32.mrf.mxu2 }
 0x161   :  { %v2088_v21 = vpop.f32.mrf.mxu2 }
 0x162   :  { %v488_v2 = vmul.f32 %v399_v0, %v2088_v21 }
 0x169   :  { %v2101_v25 = vpop.f32.mrf.mxu2 }
 0x171   :  { %v2111_v28 = vpop.f32.mrf.mxu2 }
 0x179   :  { %v2118_v30 = vpop.f32.mrf.mxu2 }
 0x181   :  { %v363_v33 = vpop.f32.mrf.mxu2 }
 0x182   :  { %v476_v34 = vmul.f32 %v363_v33, %v250_v31  ;;  %v1652_v33 = vld [vmem:[%s2724_s4 + $0xe0] sm:$0xff] }
 0x183   :  { %1360 = vmatpush.msrb.mxu3 %v1652_v33 }
 0x184   :  { %1704 = vmatmul.msk.f32.vlgmr.msra.gmra.mxu1 %vm92_vm0, %v476_v34 }
 0x189   :  { %v366_v37 = vpop.f32.mrf.mxu2 }
 0x18a   :  { %v477_v38 = vmul.f32 %v366_v37, %v253_v35  ;;  %v1651_v37 = vld [vmem:[%s2724_s4 + $0xd8] sm:$0xff] }
 0x18b   :  { %1361 = vmatpush.msrb.mxu3 %v1651_v37  ;;  %v541_v37 = vpop.permute.xlu0 %540 }
 0x18c   :  { %1705 = vmatmul.msk.f32.gmra.mxu1 %vm92_vm0, %v477_v38 }
 0x191   :  { %v369_v41 = vpop.f32.mrf.mxu2 }
 0x192   :  { %v478_v42 = vmul.f32 %v369_v41, %v256_v40  ;;  %v1650_v40 = vld [vmem:[%s2724_s4 + $0xd0] sm:$0xff]  ;;  %v526_v41 = vpop.permute.xlu1 %525 }
 0x193   :  { %1362 = vmatpush.msrb.mxu3 %v1650_v40 }
 0x194   :  { %1706 = vmatmul.msk.f32.gmra.mxu1 %vm92_vm0, %v478_v42 }
 0x199   :  { %v372_v45 = vpop.f32.mrf.mxu2 }
 0x19a   :  { %v479_v46 = vmul.f32 %v372_v45, %v259_v44  ;;  %v1649_v45 = vld [vmem:[%s2724_s4 + $0xc8] sm:$0xff] }
 0x19b   :  { %1363 = vmatpush.msrb.mxu3 %v1649_v45 }
 0x19c   :  { %1707 = vmatmul.msk.f32.gmra.mxu1 %vm92_vm0, %v479_v46 }
 0x19d   :  { %1364 = vmatpush.msrb.mxu3 %v1648_v50 }
 0x1a1   :  { %v375_v48 = vpop.f32.mrf.mxu2 }
 0x1a2   :  { %v480_v49 = vmul.f32 %v375_v48, %v2026_v63  ;;  %v486_v63 = vmul.f32 %v393_v60, %v2056_v11 }
 0x1a4   :  { %1708 = vmatmul.msk.f32.gmra.mxu1 %vm92_vm0, %v480_v49 }
 0x1a9   :  { %v378_v51 = vpop.f32.mrf.mxu2 }
 0x1aa   :  { %v481_v52 = vmul.f32 %v378_v51, %v2030_v1  ;;  %v487_v1 = vmul.f32 %v396_v62, %v2066_v14 }
 0x1ac   :  { %1709 = vmatmul.msk.f32.gmra.mxu1 %vm92_vm0, %v481_v52 }
 0x1b1   :  { %v381_v54 = vpop.f32.mrf.mxu2 }
 0x1b2   :  { %v482_v55 = vmul.f32 %v381_v54, %v2034_v3  ;;  %v402_v3 = vpop.f32.mrf.mxu3 }
 0x1b3   :  { %v489_v4 = vmul.f32 %v402_v3, %v2101_v25 }
 0x1b4   :  { %1710 = vmatmul.msk.f32.gmra.mxu1 %vm92_vm0, %v482_v55 }
 0x1b9   :  { %v384_v56 = vpop.f32.mrf.mxu2 }
 0x1ba   :  { %v483_v57 = vmul.f32 %v384_v56, %v2038_v5  ;;  %v405_v5 = vpop.f32.mrf.mxu3  ;;  %v531_v56 = vpop.permute.xlu2 %530 }
 0x1bb   :  { %v490_v6 = vmul.f32 %v405_v5, %v2111_v28 }
 0x1bc   :  { %1711 = vmatmul.msk.f32.gmra.mxu1 %vm92_vm0, %v483_v57 }
 0x1c2   :  { %v408_v7 = vpop.f32.mrf.mxu3 }
 0x1c3   :  { %v491_v8 = vmul.f32 %v408_v7, %v2118_v30 }
 0x1c4   :  { %1712 = vmatmul.msk.f32.gmra.mxu1 %vm92_vm0, %v484_v59 }
 0x1cc   :  { %1713 = vmatmul.msk.f32.gmra.mxu1 %vm92_vm0, %v485_v61 }
 0x1d4   :  { %1714 = vmatmul.msk.f32.gmra.mxu1 %vm92_vm0, %v486_v63 }
 0x1dc   :  { %1715 = vmatmul.msk.f32.gmra.mxu1 %vm92_vm0, %v487_v1 }
 0x1e4   :  { %1716 = vmatmul.msk.f32.gmra.mxu1 %vm92_vm0, %v488_v2 }
 0x1ec   :  { %1717 = vmatmul.msk.f32.gmra.mxu1 %vm92_vm0, %v489_v4 }
 0x1f4   :  { %1718 = vmatmul.msk.f32.gmra.mxu1 %vm92_vm0, %v490_v6 }
 0x1fc   :  { %1719 = vmatmul.msk.f32.gmra.mxu1 %vm92_vm0, %v491_v8 }
 0x201   :  { %v653_v10 = vpop.f32.mrf.mxu1 }
 0x202   :  { %v654_v11 = vadd.f32 %v653_v10, %v511_v9 }
 0x204   :  { %v701_v12 = vsel %vm92_vm0, %v654_v11, -inf }
 0x205   :  { %v702_v13 = vrot.slane %v701_v12, 4 }
 0x207   :  { %v703_v14 = vmax.f32 %v701_v12, %v702_v13 }
 0x209   :  { %v704_v16 = vrot.slane %v703_v14, 2  ;;  %v656_v17 = vpop.f32.mrf.mxu1 }
 0x20a   :  { %v657_v18 = vadd.f32 %v656_v17, %v516_v15  ;;  %v536_v15 = vpop.permute.xlu2 %535 }
 0x20b   :  { %v705_v19 = vmax.f32 %v703_v14, %v704_v16 }
 0x20c   :  { %v708_v20 = vsel %vm92_vm0, %v657_v18, -inf }
 0x20d   :  { %v706_v21 = vrot.slane %v705_v19, 1  ;;  %v709_v22 = vrot.slane %v708_v20, 4 }
 0x20f   :  { %v707_v24 = vmax.f32 %v705_v19, %v706_v21  ;;  %v710_v25 = vmax.f32 %v708_v20, %v709_v22 }
 0x211   :  { %v813_v26 = vsub.f32 %v654_v11, %v707_v24  ;;  %v711_v27 = vrot.slane %v710_v25, 2  ;;  %v659_v28 = vpop.f32.mrf.mxu1 }
 0x212   :  { %v660_v30 = vadd.f32 %v659_v28, %v521_v23 }
 0x213   :  { %v829_v31 = vmul.f32 1.442695, %v813_v26  ;;  %v712_v32 = vmax.f32 %v710_v25, %v711_v27 }
 0x214   :  { %v715_v34 = vsel %vm92_vm0, %v660_v30, -inf }
 0x215   :  { %1759 = vpow2.f32 %v829_v31  ;;  %v713_v35 = vrot.slane %v712_v32, 1  ;;  %v716_v36 = vrot.slane %v715_v34, 4 }
 0x217   :  { %v714_v38 = vmax.f32 %v712_v32, %v713_v35  ;;  %v717_v39 = vmax.f32 %v715_v34, %v716_v36 }
 0x219   :  { %v814_v42 = vsub.f32 %v657_v18, %v714_v38  ;;  %v718_v43 = vrot.slane %v717_v39, 2  ;;  %v662_v44 = vpop.f32.mrf.mxu1 }
 0x21a   :  { %v663_v46 = vadd.f32 %v662_v44, %v526_v41 }
 0x21b   :  { %v2184_v47 = vpop.eup %1759  ;;  %v831_v48 = vmul.f32 1.442695, %v814_v42  ;;  %v719_v49 = vmax.f32 %v717_v39, %v718_v43 }
 0x21c   :  { %v861_v51 = vsel %vm92_vm0, %v2184_v47, 0.0  ;;  %v722_v52 = vsel %vm92_vm0, %v663_v46, -inf }
 0x21d   :  { %v862_v53 = vrot.slane %v861_v51, 4  ;;  %1761 = vpow2.f32 %v831_v48  ;;  %v720_v54 = vrot.slane %v719_v49, 1  ;;  %v723_v55 = vrot.slane %v722_v52, 4 }
 0x21f   :  { %v863_v57 = vadd.f32 %v862_v53, %v861_v51  ;;  %v721_v58 = vmax.f32 %v719_v49, %v720_v54  ;;  %v724_v59 = vmax.f32 %v722_v52, %v723_v55 }
 0x221   :  { %v864_v60 = vrot.slane %v863_v57, 2  ;;  %v815_v61 = vsub.f32 %v660_v30, %v721_v58  ;;  %v725_v62 = vrot.slane %v724_v59, 2  ;;  %v665_v63 = vpop.f32.mrf.mxu1 }
 0x222   :  { %v666_v0 = vadd.f32 %v665_v63, %v531_v56 }
 0x223   :  { %v2192_v1 = vpop.eup %1761  ;;  %v865_v2 = vadd.f32 %v864_v60, %v863_v57  ;;  %v833_v3 = vmul.f32 1.442695, %v815_v61  ;;  %v726_v4 = vmax.f32 %v724_v59, %v725_v62 }
 0x224   :  { %v868_v5 = vsel %vm92_vm0, %v2192_v1, 0.0  ;;  %v729_v6 = vsel %vm92_vm0, %v666_v0, -inf }
 0x225   :  { %v866_v7 = vrot.slane %v865_v2, 1  ;;  %v869_v8 = vrot.slane %v868_v5, 4  ;;  %1763 = vpow2.f32 %v833_v3  ;;  %v727_v9 = vrot.slane %v726_v4, 1 }
 0x226   :  { %v730_v10 = vrot.slane %v729_v6, 4 }
 0x227   :  { %v867_v11 = vadd.f32 %v866_v7, %v865_v2  ;;  %v870_v12 = vadd.f32 %v869_v8, %v868_v5  ;;  %v728_v13 = vmax.f32 %v726_v4, %v727_v9 }
 0x228   :  { %v731_v14 = vmax.f32 %v729_v6, %v730_v10  ;;  %v546_v6 = vpop.permute.xlu1 %545 }
 0x229   :  { %1765 = vrcp.f32 %v867_v11  ;;  %v871_v16 = vrot.slane %v870_v12, 2  ;;  %v816_v17 = vsub.f32 %v663_v46, %v728_v13  ;;  %v668_v18 = vpop.f32.mrf.mxu1  ;;  %v982_v44 = vand.u32 2147483647, %v867_v11 }
 0x22a   :  { %v732_v19 = vrot.slane %v731_v14, 2  ;;  %v2197_v20 = vadd.f32 %v668_v18, %v536_v15  ;;  %v984_v49 = vand.u32 2147483648, %v867_v11  ;;  %vm978_vm3 = vweird.f32 %v867_v11 }
 0x22b   :  { %v2199_v21 = vpop.eup %1763  ;;  %v872_v22 = vadd.f32 %v871_v16, %v870_v12  ;;  %v835_v23 = vmul.f32 1.442695, %v816_v17  ;;  %vm2216_vm4 = vcmp.eq.f32.partialorder %v982_v44, 8.507059e+37 }
 0x22c   :  { %v875_v24 = vsel %vm92_vm0, %v2199_v21, 0.0  ;;  %v733_v25 = vmax.f32 %v731_v14, %v732_v19  ;;  %v736_v26 = vsel %vm92_vm0, %v2197_v20, -inf  ;;  %v985_v3 = vor.u32 1.1754944e-38, %v984_v49 }
 0x22d   :  { %v873_v27 = vrot.slane %v872_v22, 1  ;;  %v876_v28 = vrot.slane %v875_v24, 4  ;;  %1767 = vpow2.f32 %v835_v23  ;;  %v737_v29 = vrot.slane %v736_v26, 4 }
 0x22e   :  { %v734_v30 = vrot.slane %v733_v25, 1 }
 0x22f   :  { %v1766_v31 = vpop.eup %1765  ;;  %v2205_v32 = vadd.f32 %v873_v27, %v872_v22  ;;  %v877_v33 = vadd.f32 %v876_v28, %v875_v24  ;;  %v738_v34 = vmax.f32 %v736_v26, %v737_v29 }
 0x230   :  { %v735_v35 = vmax.f32 %v733_v25, %v734_v30  ;;  %v974_v36 = vmul.f32 %v1766_v31, %v867_v11  ;;  %vm979_vm2 = vweird.f32 %v1766_v31 }
 0x231   :  { %1769 = vrcp.f32 %v2205_v32  ;;  %v878_v38 = vrot.slane %v877_v33, 2  ;;  %v739_v39 = vrot.slane %v738_v34, 2  ;;  %v671_v40 = vpop.f32.mrf.mxu1  ;;  %vm980_vm5 = vmor %vm978_vm3, %vm979_vm2  ;;  %v997_v5 = vand.u32 2147483647, %v2205_v32 }
 0x232   :  { %v817_v41 = vsub.f32 %v666_v0, %v735_v35  ;;  %v2208_v42 = vadd.f32 %v671_v40, %v541_v37  ;;  %v975_v43 = vsub.f32 1.0, %v974_v36  ;;  %v999_v14 = vand.u32 2147483648, %v2205_v32  ;;  %v551_v37 = vpop.permute.xlu2 %550 }
 0x233   :  { %v2210_v45 = vpop.eup %1767  ;;  %v879_v46 = vadd.f32 %v878_v38, %v877_v33  ;;  %v740_v48 = vmax.f32 %v738_v34, %v739_v39  ;;  %vm993_vm7 = vweird.f32 %v2205_v32  ;;  %vm998_vm9 = vcmp.eq.f32.partialorder %v997_v5, 8.507059e+37  ;;  %v556_v5 = vpop.permute.xlu0 %555 }
 0x234   :  { %v882_v50 = vsel %vm92_vm0, %v2210_v45, 0.0  ;;  %v837_v51 = vmul.f32 1.442695, %v817_v41  ;;  %v743_v52 = vsel %vm92_vm0, %v2208_v42, -inf  ;;  %v976_v53 = vmul.f32 %v1766_v31, %v975_v43 }
 0x235   :  { %v880_v54 = vrot.slane %v879_v46, 1  ;;  %v883_v55 = vrot.slane %v882_v50, 4  ;;  %v741_v56 = vrot.slane %v740_v48, 1  ;;  %v744_v57 = vrot.slane %v743_v52, 4 }
 0x236   :  { %1771 = vpow2.f32 %v837_v51  ;;  %v977_v58 = vadd.f32 %v1766_v31, %v976_v53 }
 0x237   :  { %v1770_v60 = vpop.eup %1769  ;;  %v2220_v61 = vadd.f32 %v880_v54, %v879_v46  ;;  %v884_v62 = vadd.f32 %v883_v55, %v882_v50  ;;  %v742_v63 = vmax.f32 %v740_v48, %v741_v56  ;;  %v745_v0 = vmax.f32 %v743_v52, %v744_v57 }
 0x238   :  { %v981_v2 = vsel %vm980_vm5, %v1766_v31, %v977_v58  ;;  %v989_v4 = vmul.f32 %v1770_v60, %v2205_v32  ;;  %vm994_vm6 = vweird.f32 %v1770_v60  ;;  %v1000_v31 = vor.u32 1.1754944e-38, %v999_v14 }
 0x239   :  { %1773 = vrcp.f32 %v2220_v61  ;;  %v885_v7 = vrot.slane %v884_v62, 2  ;;  %v818_v8 = vsub.f32 %v2197_v20, %v742_v63  ;;  %v746_v9 = vrot.slane %v745_v0, 2  ;;  %v674_v10 = vpop.f32.mrf.mxu1  ;;  %vm995_vm8 = vmor %vm993_vm7, %vm994_vm6 }
 0x23a   :  { %v2227_v11 = vadd.f32 %v674_v10, %v546_v6  ;;  %v986_v12 = vsel %vm2216_vm4, %v985_v3, %v981_v2  ;;  %v990_v13 = vsub.f32 1.0, %v989_v4  ;;  %v1012_v32 = vand.u32 2147483647, %v2220_v61 }
 0x23b   :  { %v886_v15 = vadd.f32 %v885_v7, %v884_v62  ;;  %v839_v16 = vmul.f32 1.442695, %v818_v8  ;;  %v747_v17 = vmax.f32 %v745_v0, %v746_v9  ;;  %v2233_v18 = vmul.f32 %v2184_v47, %v986_v12 }
 0x23c   :  { %v2235_v19 = vpop.eup %1771  ;;  %v750_v20 = vsel %vm92_vm0, %v2227_v11, -inf  ;;  %v991_v22 = vmul.f32 %v1770_v60, %v990_v13  ;;  %v1014_v51 = vand.u32 2147483648, %v2220_v61  ;;  %vm1008_vm11 = vweird.f32 %v2220_v61 }
 0x23d   :  { %v887_v23 = vrot.slane %v886_v15, 1  ;;  %v889_v24 = vsel %vm92_vm0, %v2235_v19, 0.0  ;;  %1775 = vpow2.f32 %v839_v16  ;;  %v748_v25 = vrot.slane %v747_v17, 1  ;;  %1720 = vmatmul.msk.f32.vlgmr.msrb.gmra.mxu3 %vm92_vm0, %v2233_v18 }
 0x23e   :  { %v890_v26 = vrot.slane %v889_v24, 4  ;;  %v751_v27 = vrot.slane %v750_v20, 4  ;;  %v992_v47 = vadd.f32 %v1770_v60, %v991_v22  ;;  %vm1013_vm12 = vcmp.eq.f32.partialorder %v1012_v32, 8.507059e+37 }
 0x23f   :  { %v1774_v28 = vpop.eup %1773  ;;  %v2244_v29 = vadd.f32 %v887_v23, %v886_v15  ;;  %v749_v30 = vmax.f32 %v747_v17, %v748_v25  ;;  %v1015_v3 = vor.u32 1.1754944e-38, %v1014_v51 }
 0x240   :  { %v891_v33 = vadd.f32 %v890_v26, %v889_v24  ;;  %v752_v34 = vmax.f32 %v750_v20, %v751_v27  ;;  %v996_v35 = vsel %vm995_vm8, %v1770_v60, %v992_v47  ;;  %v1004_v36 = vmul.f32 %v1774_v28, %v2220_v61 }
 0x241   :  { %1777 = vrcp.f32 %v2244_v29  ;;  %v819_v38 = vsub.f32 %v2208_v42, %v749_v30  ;;  %v677_v39 = vpop.f32.mrf.mxu1  ;;  %v1001_v40 = vsel %vm998_vm9, %v1000_v31, %v996_v35  ;;  %vm1009_vm10 = vweird.f32 %v1774_v28 }
 0x242   :  { %v892_v41 = vrot.slane %v891_v33, 2  ;;  %v753_v43 = vrot.slane %v752_v34, 2  ;;  %v2250_v44 = vadd.f32 %v677_v39, %v551_v37  ;;  %v2253_v46 = vmul.f32 %v2192_v1, %v1001_v40  ;;  %vm1010_vm13 = vmor %vm1008_vm11, %vm1009_vm10  ;;  %v561_v39 = vpop.permute.xlu1 %560 }
 0x243   :  { %v2255_v48 = vpop.eup %1775  ;;  %v841_v49 = vmul.f32 1.442695, %v819_v38  ;;  %v1005_v50 = vsub.f32 1.0, %v1004_v36  ;;  %v1027_v9 = vand.u32 2147483647, %v2244_v29  ;;  %vm1023_vm14 = vweird.f32 %v2244_v29 }
 0x244   :  { %v893_v52 = vadd.f32 %v892_v41, %v891_v33  ;;  %v896_v42 = vsel %vm92_vm0, %v2255_v48, 0.0  ;;  %v754_v53 = vmax.f32 %v752_v34, %v753_v43  ;;  %v757_v54 = vsel %vm92_vm0, %v2250_v44, -inf }
 0x245   :  { %v897_v55 = vrot.slane %v896_v42, 4  ;;  %1779 = vpow2.f32 %v841_v49  ;;  %v758_v56 = vrot.slane %v757_v54, 4  ;;  %1721 = vmatmul.msk.f32.gmra.mxu3 %vm92_vm0, %v2253_v46  ;;  %v1006_v1 = vmul.f32 %v1774_v28, %v1005_v50 }
 0x246   :  { %v894_v57 = vrot.slane %v893_v52, 1  ;;  %v755_v58 = vrot.slane %v754_v53, 1  ;;  %vm2295_vm1 = vcmp.eq.f32.partialorder %v1027_v9, 8.507059e+37  ;;  %v566_v9 = vpop.permute.xlu2 %565 }
 0x247   :  { %v2265_v59 = vpop.eup %1777  ;;  %v898_v60 = vadd.f32 %v897_v55, %v896_v42  ;;  %v759_v62 = vmax.f32 %v757_v54, %v758_v56  ;;  %v1007_v63 = vadd.f32 %v1774_v28, %v1006_v1 }
 0x248   :  { %v2267_v0 = vadd.f32 %v894_v57, %v893_v52  ;;  %v756_v2 = vmax.f32 %v754_v53, %v755_v58  ;;  %v1019_v4 = vmul.f32 %v2265_v59, %v2244_v29  ;;  %vm1024_vm15 = vweird.f32 %v2265_v59 }
 0x249   :  { %v899_v6 = vrot.slane %v898_v60, 2  ;;  %v760_v7 = vrot.slane %v759_v62, 2  ;;  %v680_v8 = vpop.f32.mrf.mxu1  ;;  %v1011_v61 = vsel %vm1010_vm13, %v1774_v28, %v1007_v63  ;;  %vm1025_vm2 = vmor %vm1023_vm14, %vm1024_vm15 }
 0x24a   :  { %1781 = vrcp.f32 %v2267_v0  ;;  %v820_v10 = vsub.f32 %v2227_v11, %v756_v2  ;;  %v2275_v12 = vadd.f32 %v680_v8, %v556_v5  ;;  %v1016_v13 = vsel %vm1013_vm12, %v1015_v3, %v1011_v61 }
 0x24b   :  { %v2277_v14 = vpop.eup %1779  ;;  %v900_v15 = vadd.f32 %v899_v6, %v898_v60  ;;  %v761_v16 = vmax.f32 %v759_v62, %v760_v7  ;;  %v2280_v17 = vmul.f32 %v2199_v21, %v1016_v13  ;;  %v1020_v20 = vsub.f32 1.0, %v1019_v4 }
 0x24c   :  { %v903_v22 = vsel %vm92_vm0, %v2277_v14, 0.0  ;;  %v843_v23 = vmul.f32 1.442695, %v820_v10  ;;  %v764_v24 = vsel %vm92_vm0, %v2275_v12, -inf  ;;  %v1029_v11 = vand.u32 2147483648, %v2244_v29 }
 0x24d   :  { %v901_v25 = vrot.slane %v900_v15, 1  ;;  %v904_v26 = vrot.slane %v903_v22, 4  ;;  %v762_v27 = vrot.slane %v761_v16, 1  ;;  %v765_v47 = vrot.slane %v764_v24, 4  ;;  %1722 = vmatmul.msk.f32.gmra.mxu3 %vm92_vm0, %v2280_v17 }
 0x24e   :  { %1783 = vpow2.f32 %v843_v23  ;;  %v1021_v21 = vmul.f32 %v2265_v59, %v1020_v20  ;;  %v1030_v37 = vor.u32 1.1754944e-38, %v1029_v11  ;;  %v1042_v38 = vand.u32 2147483647, %v2267_v0 }
 0x24f   :  { %v2292_v28 = vadd.f32 %v901_v25, %v900_v15  ;;  %v905_v30 = vadd.f32 %v904_v26, %v903_v22  ;;  %v763_v31 = vmax.f32 %v761_v16, %v762_v27  ;;  %v766_v33 = vmax.f32 %v764_v24, %v765_v47 }
 0x250   :  { %v1782_v34 = vpop.eup %1781  ;;  %v1022_v35 = vadd.f32 %v2265_v59, %v1021_v21  ;;  %v1044_v52 = vand.u32 2147483648, %v2267_v0  ;;  %vm1038_vm3 = vweird.f32 %v2267_v0  ;;  %vm2329_vm5 = vcmp.eq.f32.partialorder %v1042_v38, 8.507059e+37 }
 0x251   :  { %1785 = vrcp.f32 %v2292_v28  ;;  %v906_v40 = vrot.slane %v905_v30, 2  ;;  %v821_v32 = vsub.f32 %v2250_v44, %v763_v31  ;;  %v767_v41 = vrot.slane %v766_v33, 2  ;;  %v683_v43 = vpop.f32.mrf.mxu1 }
 0x252   :  { %v2306_v49 = vadd.f32 %v683_v43, %v561_v39  ;;  %v1026_v50 = vsel %vm1025_vm2, %v2265_v59, %v1022_v35  ;;  %v1034_v51 = vmul.f32 %v1782_v34, %v2267_v0  ;;  %vm1039_vm4 = vweird.f32 %v1782_v34 }
 0x253   :  { %v907_v42 = vadd.f32 %v906_v40, %v905_v30  ;;  %v845_v53 = vmul.f32 1.442695, %v821_v32  ;;  %v768_v54 = vmax.f32 %v766_v33, %v767_v41  ;;  %v1031_v44 = vsel %vm2295_vm1, %v1030_v37, %v1026_v50  ;;  %vm1040_vm6 = vmor %vm1038_vm3, %vm1039_vm4 }
 0x254   :  { %v2313_v55 = vpop.eup %1783  ;;  %v771_v29 = vsel %vm92_vm0, %v2306_v49, -inf  ;;  %v2318_v56 = vmul.f32 %v2210_v45, %v1031_v44  ;;  %v1035_v1 = vsub.f32 1.0, %v1034_v51  ;;  %v1045_v5 = vor.u32 1.1754944e-38, %v1044_v52  ;;  %v571_v51 = vpop.permute.xlu0 %570 }
 0x255   :  { %v908_v57 = vrot.slane %v907_v42, 1  ;;  %v910_v58 = vsel %vm92_vm0, %v2313_v55, 0.0  ;;  %1787 = vpow2.f32 %v845_v53  ;;  %v769_v59 = vrot.slane %v768_v54, 1 }
 0x256   :  { %v911_v60 = vrot.slane %v910_v58, 4  ;;  %v772_v62 = vrot.slane %v771_v29, 4  ;;  %1723 = vmatmul.msk.f32.gmra.mxu3 %vm92_vm0, %v2318_v56  ;;  %v1036_v63 = vmul.f32 %v1782_v34, %v1035_v1  ;;  %vm1053_vm7 = vweird.f32 %v2292_v28 }
 0x257   :  { %v2325_v2 = vpop.eup %1785  ;;  %v2327_v45 = vadd.f32 %v908_v57, %v907_v42  ;;  %v770_v3 = vmax.f32 %v768_v54, %v769_v59  ;;  %v1057_v15 = vand.u32 2147483647, %v2292_v28  ;;  %v1059_v26 = vand.u32 2147483648, %v2292_v28 }
 0x258   :  { %v912_v6 = vadd.f32 %v911_v60, %v910_v58  ;;  %v773_v7 = vmax.f32 %v771_v29, %v772_v62  ;;  %v1037_v8 = vadd.f32 %v1782_v34, %v1036_v63  ;;  %v1049_v61 = vmul.f32 %v2325_v2, %v2292_v28 }
 0x259   :  { %1789 = vrcp.f32 %v2327_v45  ;;  %v822_v10 = vsub.f32 %v2275_v12, %v770_v3  ;;  %v686_v13 = vpop.f32.mrf.mxu1  ;;  %vm1054_vm8 = vweird.f32 %v2325_v2  ;;  %vm2361_vm9 = vcmp.eq.f32.partialorder %v1057_v15, 8.507059e+37 }
 0x25a   :  { %v913_v16 = vrot.slane %v912_v6, 2  ;;  %v774_v20 = vrot.slane %v773_v7, 2  ;;  %v2341_v22 = vadd.f32 %v686_v13, %v566_v9  ;;  %v1041_v23 = vsel %vm1040_vm6, %v1782_v34, %v1037_v8  ;;  %vm1055_vm10 = vmor %vm1053_vm7, %vm1054_vm8 }
 0x25b   :  { %v2343_v24 = vpop.eup %1787  ;;  %v847_v11 = vmul.f32 1.442695, %v822_v10  ;;  %v1046_v25 = vsel %vm2329_vm5, %v1045_v5, %v1041_v23  ;;  %v1050_v12 = vsub.f32 1.0, %v1049_v61  ;;  %v1060_v32 = vor.u32 1.1754944e-38, %v1059_v26  ;;  %v576_v23 = vpop.permute.xlu1 %575 }
 0x25c   :  { %v914_v0 = vadd.f32 %v913_v16, %v912_v6  ;;  %v917_v27 = vsel %vm92_vm0, %v2343_v24, 0.0  ;;  %v775_v47 = vmax.f32 %v773_v7, %v774_v20  ;;  %v778_v21 = vsel %vm92_vm0, %v2341_v22, -inf }
 0x25d   :  { %v918_v30 = vrot.slane %v917_v27, 4  ;;  %1791 = vpow2.f32 %v847_v11  ;;  %v779_v31 = vrot.slane %v778_v21, 4  ;;  %v2353_v33 = vmul.f32 %v2235_v19, %v1046_v25 }
 0x25e   :  { %v915_v34 = vrot.slane %v914_v0, 1  ;;  %v776_v35 = vrot.slane %v775_v47, 1  ;;  %v1051_v36 = vmul.f32 %v2325_v2, %v1050_v12  ;;  %v1072_v54 = vand.u32 2147483647, %v2327_v45 }
 0x25f   :  { %v2357_v37 = vpop.eup %1789  ;;  %v919_v38 = vadd.f32 %v918_v30, %v917_v27  ;;  %v780_v39 = vmax.f32 %v778_v21, %v779_v31  ;;  %1724 = vmatmul.msk.f32.gmra.mxu3 %vm92_vm0, %v2353_v33  ;;  %v1074_v44 = vand.u32 2147483648, %v2327_v45  ;;  %vm1068_vm12 = vweird.f32 %v2327_v45 }
 0x260   :  { %v2365_v19 = vadd.f32 %v915_v34, %v914_v0  ;;  %v777_v41 = vmax.f32 %v775_v47, %v776_v35  ;;  %v1052_v43 = vadd.f32 %v2325_v2, %v1051_v36  ;;  %v1064_v50 = vmul.f32 %v2357_v37, %v2327_v45 }
 0x261   :  { %v920_v52 = vrot.slane %v919_v38, 2  ;;  %v781_v42 = vrot.slane %v780_v39, 2  ;;  %v689_v53 = vpop.f32.mrf.mxu1  ;;  %vm1069_vm11 = vweird.f32 %v2357_v37  ;;  %vm2400_vm13 = vcmp.eq.f32.partialorder %v1072_v54, 8.507059e+37 }
 0x262   :  { %1793 = vrcp.f32 %v2365_v19  ;;  %v823_v29 = vsub.f32 %v2306_v49, %v777_v41  ;;  %v2378_v1 = vadd.f32 %v689_v53, %v571_v51  ;;  %v1056_v57 = vsel %vm1055_vm10, %v2325_v2, %v1052_v43  ;;  %vm1070_vm14 = vmor %vm1068_vm12, %vm1069_vm11 }
 0x263   :  { %v2381_v58 = vpop.eup %1791  ;;  %v921_v59 = vadd.f32 %v920_v52, %v919_v38  ;;  %v782_v60 = vmax.f32 %v780_v39, %v781_v42  ;;  %v1061_v28 = vsel %vm2361_vm9, %v1060_v32, %v1056_v57  ;;  %v1065_v62 = vsub.f32 1.0, %v1064_v50  ;;  %v581_v57 = vpop.permute.xlu2 %580 }
 0x264   :  { %v924_v63 = vsel %vm92_vm0, %v2381_v58, 0.0  ;;  %v849_v3 = vmul.f32 1.442695, %v823_v29  ;;  %v785_v4 = vsel %vm92_vm0, %v2378_v1, -inf  ;;  %v2390_v49 = vmul.f32 %v2255_v48, %v1061_v28 }
 0x265   :  { %v922_v5 = vrot.slane %v921_v59, 1  ;;  %v925_v2 = vrot.slane %v924_v63, 4  ;;  %v783_v6 = vrot.slane %v782_v60, 1  ;;  %v786_v7 = vrot.slane %v785_v4, 4 }
 0x266   :  { %1795 = vpow2.f32 %v849_v3  ;;  %v1066_v8 = vmul.f32 %v2357_v37, %v1065_v62  ;;  %v1075_v20 = vor.u32 1.1754944e-38, %v1074_v44  ;;  %v1087_v47 = vand.u32 2147483647, %v2365_v19 }
 0x267   :  { %v2394_v61 = vadd.f32 %v922_v5, %v921_v59  ;;  %v926_v9 = vadd.f32 %v925_v2, %v924_v63  ;;  %v784_v10 = vmax.f32 %v782_v60, %v783_v6  ;;  %v787_v13 = vmax.f32 %v785_v4, %v786_v7  ;;  %1725 = vmatmul.msk.f32.gmra.mxu3 %vm92_vm0, %v2390_v49 }
 0x268   :  { %v1794_v15 = vpop.eup %1793  ;;  %v1067_v48 = vadd.f32 %v2357_v37, %v1066_v8  ;;  %vm1083_vm1 = vweird.f32 %v2365_v19  ;;  %vm2432_vm2 = vcmp.eq.f32.partialorder %v1087_v47, 8.507059e+37 }
 0x269   :  { %1797 = vrcp.f32 %v2394_v61  ;;  %v927_v11 = vrot.slane %v926_v9, 2  ;;  %v824_v25 = vsub.f32 %v2341_v22, %v784_v10  ;;  %v788_v12 = vrot.slane %v787_v13, 2  ;;  %v692_v26 = vpop.f32.mrf.mxu1 }
 0x26a   :  { %v2408_v0 = vadd.f32 %v692_v26, %v576_v23  ;;  %v1071_v45 = vsel %vm1070_vm14, %v2357_v37, %v1067_v48  ;;  %v1079_v27 = vmul.f32 %v1794_v15, %v2365_v19  ;;  %v1089_v37 = vand.u32 2147483648, %v2365_v19 }
 0x26b   :  { %v928_v21 = vadd.f32 %v927_v11, %v926_v9  ;;  %v851_v30 = vmul.f32 1.442695, %v824_v25  ;;  %v789_v31 = vmax.f32 %v787_v13, %v788_v12  ;;  %v1076_v34 = vsel %vm2400_vm13, %v1075_v20, %v1071_v45 }
 0x26c   :  { %v2415_v22 = vpop.eup %1795  ;;  %v792_v35 = vsel %vm92_vm0, %v2408_v0, -inf  ;;  %v2420_v36 = vmul.f32 %v2277_v14, %v1076_v34  ;;  %v1080_v38 = vsub.f32 1.0, %v1079_v27  ;;  %vm1084_vm15 = vweird.f32 %v1794_v15 }
 0x26d   :  { %v929_v39 = vrot.slane %v928_v21, 1  ;;  %v931_v40 = vsel %vm92_vm0, %v2415_v22, 0.0  ;;  %1799 = vpow2.f32 %v851_v30  ;;  %v790_v32 = vrot.slane %v789_v31, 1  ;;  %vm1085_vm3 = vmor %vm1083_vm1, %vm1084_vm15  ;;  %v586_v30 = vpop.permute.xlu0 %585 }
 0x26e   :  { %v932_v41 = vrot.slane %v931_v40, 4  ;;  %v793_v43 = vrot.slane %v792_v35, 4  ;;  %v1081_v50 = vmul.f32 %v1794_v15, %v1080_v38  ;;  %v1090_v28 = vor.u32 1.1754944e-38, %v1089_v37 }
 0x26f   :  { %v2425_v51 = vpop.eup %1797  ;;  %v2427_v52 = vadd.f32 %v929_v39, %v928_v21  ;;  %v791_v42 = vmax.f32 %v789_v31, %v790_v32  ;;  %1726 = vmatmul.msk.f32.gmra.mxu3 %vm92_vm0, %v2420_v36  ;;  %v1102_v19 = vand.u32 2147483647, %v2394_v61  ;;  %vm1098_vm5 = vweird.f32 %v2394_v61 }
 0x270   :  { %v933_v53 = vadd.f32 %v932_v41, %v931_v40  ;;  %v794_v54 = vmax.f32 %v792_v35, %v793_v43  ;;  %v1082_v44 = vadd.f32 %v1794_v15, %v1081_v50  ;;  %v1094_v29 = vmul.f32 %v2425_v51, %v2394_v61 }
 0x271   :  { %1801 = vrcp.f32 %v2427_v52  ;;  %v825_v59 = vsub.f32 %v2378_v1, %v791_v42  ;;  %v695_v60 = vpop.f32.mrf.mxu1  ;;  %v1104_v1 = vand.u32 2147483648, %v2394_v61  ;;  %vm1099_vm4 = vweird.f32 %v2425_v51 }
 0x272   :  { %v934_v62 = vrot.slane %v933_v53, 2  ;;  %v795_v63 = vrot.slane %v794_v54, 2  ;;  %v2442_v3 = vadd.f32 %v695_v60, %v581_v57  ;;  %v1086_v4 = vsel %vm1085_vm3, %v1794_v15, %v1082_v44  ;;  %vm1100_vm7 = vmor %vm1098_vm5, %vm1099_vm4 }
 0x273   :  { %v2444_v5 = vpop.eup %1799  ;;  %v853_v2 = vmul.f32 1.442695, %v825_v59  ;;  %v1091_v6 = vsel %vm2432_vm2, %v1090_v28, %v1086_v4  ;;  %v1095_v7 = vsub.f32 1.0, %v1094_v29  ;;  %vm2461_vm6 = vcmp.eq.f32.partialorder %v1102_v19, 8.507059e+37 }
 0x274   :  { %v935_v8 = vadd.f32 %v934_v62, %v933_v53  ;;  %v938_v9 = vsel %vm92_vm0, %v2444_v5, 0.0  ;;  %v796_v10 = vmax.f32 %v794_v54, %v795_v63  ;;  %v799_v13 = vsel %vm92_vm0, %v2442_v3, -inf }
 0x275   :  { %v939_v48 = vrot.slane %v938_v9, 4  ;;  %1803 = vpow2.f32 %v853_v2  ;;  %v800_v15 = vrot.slane %v799_v13, 4  ;;  %v2454_v16 = vmul.f32 %v2313_v55, %v1091_v6 }
 0x276   :  { %v936_v20 = vrot.slane %v935_v8, 1  ;;  %v797_v23 = vrot.slane %v796_v10, 1  ;;  %v1096_v11 = vmul.f32 %v2425_v51, %v1095_v7  ;;  %v1105_v38 = vor.u32 1.1754944e-38, %v1104_v1 }
 0x277   :  { %v1802_v25 = vpop.eup %1801  ;;  %v940_v12 = vadd.f32 %v939_v48, %v938_v9  ;;  %v801_v26 = vmax.f32 %v799_v13, %v800_v15  ;;  %1727 = vmatmul.msk.f32.gmra.mxu3 %vm92_vm0, %v2454_v16  ;;  %v1117_v61 = vand.u32 2147483647, %v2427_v52  ;;  %v1119_v60 = vand.u32 2147483648, %v2427_v52 }
 0x278   :  { %v2465_v55 = vadd.f32 %v936_v20, %v935_v8  ;;  %v798_v27 = vmax.f32 %v796_v10, %v797_v23  ;;  %v1097_v47 = vadd.f32 %v2425_v51, %v1096_v11  ;;  %v1109_v21 = vmul.f32 %v1802_v25, %v2427_v52 }
 0x279   :  { %v941_v31 = vrot.slane %v940_v12, 2  ;;  %v802_v34 = vrot.slane %v801_v26, 2  ;;  %v698_v35 = vpop.f32.mrf.mxu1  ;;  %vm1114_vm8 = vweird.f32 %v1802_v25  ;;  %vm1113_vm9 = vweird.f32 %v2427_v52 }
 0x27a   :  { %1805 = vrcp.f32 %v2465_v55  ;;  %v826_v37 = vsub.f32 %v2408_v0, %v798_v27  ;;  %v2474_v39 = vadd.f32 %v698_v35, %v586_v30  ;;  %v1101_v40 = vsel %vm1100_vm7, %v2425_v51, %v1097_v47  ;;  %vm1115_vm10 = vmor %vm1113_vm9, %vm1114_vm8 }
 0x27b   :  { %v2477_v32 = vpop.eup %1803  ;;  %v942_v41 = vadd.f32 %v941_v31, %v940_v12  ;;  %v803_v43 = vmax.f32 %v801_v26, %v802_v34  ;;  %v1106_v50 = vsel %vm2461_vm6, %v1105_v38, %v1101_v40  ;;  %v1110_v42 = vsub.f32 1.0, %v1109_v21 }
 0x27c   :  { %v945_v14 = vsel %vm92_vm0, %v2477_v32, 0.0  ;;  %v855_v53 = vmul.f32 1.442695, %v826_v37  ;;  %v806_v54 = vsel %vm92_vm0, %v2474_v39, -inf  ;;  %v2486_v0 = vmul.f32 %v2343_v24, %v1106_v50 }
 0x27d   :  { %v943_v44 = vrot.slane %v942_v41, 1  ;;  %v946_v51 = vrot.slane %v945_v14, 4  ;;  %v804_v29 = vrot.slane %v803_v43, 1  ;;  %v807_v57 = vrot.slane %v806_v54, 4 }
 0x27e   :  { %1807 = vpow2.f32 %v855_v53  ;;  %v1111_v59 = vmul.f32 %v1802_v25, %v1110_v42  ;;  %v1120_v2 = vor.u32 1.1754944e-38, %v1119_v60  ;;  %vm1118_vm11 = vcmp.eq.f32.partialorder %v1117_v61, 8.507059e+37 }
 0x27f   :  { %v2489_v28 = vadd.f32 %v943_v44, %v942_v41  ;;  %v947_v19 = vadd.f32 %v946_v51, %v945_v14  ;;  %v805_v62 = vmax.f32 %v803_v43, %v804_v29  ;;  %v808_v63 = vmax.f32 %v806_v54, %v807_v57  ;;  %1728 = vmatmul.msk.f32.gmra.mxu3 %vm92_vm0, %v2486_v0 }
 0x280   :  { %v1806_v4 = vpop.eup %1805  ;;  %v1112_v24 = vadd.f32 %v1802_v25, %v1111_v59  ;;  %v1132_v11 = vand.u32 2147483647, %v2465_v55  ;;  %vm1128_vm13 = vweird.f32 %v2465_v55  ;;  %vm1213_vm9 = vcmask 97280  }
 0x281   :  { %1809 = vrcp.f32 %v2489_v28  ;;  %v948_v6 = vrot.slane %v947_v19, 2  ;;  %v827_v7 = vsub.f32 %v2442_v3, %v805_v62  ;;  %v809_v1 = vrot.slane %v808_v63, 2 }
 0x282   :  { %v1116_v8 = vsel %vm1115_vm10, %v1802_v25, %v1112_v24  ;;  %v1124_v9 = vmul.f32 %v1806_v4, %v2465_v55  ;;  %v1134_v3 = vand.u32 2147483648, %v2465_v55  ;;  %vm1129_vm12 = vweird.f32 %v1806_v4 }
 0x283   :  { %v949_v10 = vadd.f32 %v948_v6, %v947_v19  ;;  %v857_v13 = vmul.f32 1.442695, %v827_v7  ;;  %v810_v48 = vmax.f32 %v808_v63, %v809_v1  ;;  %v1121_v15 = vsel %vm1118_vm11, %v1120_v2, %v1116_v8  ;;  %vm1130_vm14 = vmor %vm1128_vm13, %vm1129_vm12 }
 0x284   :  { %v2498_v20 = vpop.eup %1807  ;;  %v2501_v52 = vmul.f32 %v2381_v58, %v1121_v15  ;;  %v1125_v23 = vsub.f32 1.0, %v1124_v9  ;;  %vm1133_vm15 = vcmp.eq.f32.partialorder %v1132_v11, 8.507059e+37  ;;  %v1135_v38 = vor.u32 1.1754944e-38, %v1134_v3 }
 0x285   :  { %v950_v12 = vrot.slane %v949_v10, 1  ;;  %v952_v25 = vsel %vm92_vm0, %v2498_v20, 0.0  ;;  %1811 = vpow2.f32 %v857_v13  ;;  %v811_v26 = vrot.slane %v810_v48, 1 }
 0x286   :  { %v953_v45 = vrot.slane %v952_v25, 4  ;;  %v1126_v27 = vmul.f32 %v1806_v4, %v1125_v23  ;;  %v1147_v41 = vand.u32 2147483647, %v2489_v28  ;;  %v1149_v55 = vand.u32 2147483648, %v2489_v28 }
 0x287   :  { %v1810_v47 = vpop.eup %1809  ;;  %v2507_v21 = vadd.f32 %v950_v12, %v949_v10  ;;  %v812_v30 = vmax.f32 %v810_v48, %v811_v26  ;;  %1729 = vmatmul.msk.f32.gmra.mxu3 %vm92_vm0, %v2501_v52  ;;  %vm1143_vm2 = vweird.f32 %v2489_v28 }
 0x288   :  { %v954_v58 = vadd.f32 %v953_v45, %v952_v25  ;;  %v1127_v31 = vadd.f32 %v1806_v4, %v1126_v27  ;;  %v1139_v34 = vmul.f32 %v1810_v47, %v2489_v28  ;;  %vm1144_vm1 = vweird.f32 %v1810_v47 }
 0x289   :  { %1813 = vrcp.f32 %v2507_v21  ;;  %v828_v35 = vsub.f32 %v2474_v39, %v812_v30  ;;  %vm1145_vm3 = vmor %vm1143_vm2, %vm1144_vm1  ;;  %v1150_v60 = vor.u32 1.1754944e-38, %v1149_v55  ;;  %vm1148_vm4 = vcmp.eq.f32.partialorder %v1147_v41, 8.507059e+37 }
 0x28a   :  { %v955_v61 = vrot.slane %v954_v58, 2  ;;  %v1131_v37 = vsel %vm1130_vm14, %v1806_v4, %v1127_v31  ;;  %v1140_v40 = vsub.f32 1.0, %v1139_v34  ;;  %v1164_v7 = vand.u32 2147483648, %v2507_v21 }
 0x28b   :  { %v2516_v43 = vpop.eup %1811  ;;  %v859_v50 = vmul.f32 1.442695, %v828_v35  ;;  %v1136_v42 = vsel %vm1133_vm15, %v1135_v38, %v1131_v37  ;;  %v1162_v9 = vand.u32 2147483647, %v2507_v21  ;;  %vm1158_vm6 = vweird.f32 %v2507_v21 }
 0x28c   :  { %v956_v14 = vadd.f32 %v955_v61, %v954_v58  ;;  %v959_v53 = vsel %vm92_vm0, %v2516_v43, 0.0  ;;  %v2522_v39 = vmul.f32 %v2415_v22, %v1136_v42  ;;  %v1141_v54 = vmul.f32 %v1810_v47, %v1140_v40  ;;  %v428_v42 = vpop.f32.mrf.mxu0 }
 0x28d   :  { %v960_v44 = vrot.slane %v959_v53, 4  ;;  %1815 = vpow2.f32 %v859_v50  ;;  %vm1163_vm8 = vcmp.eq.f32.partialorder %v1162_v9, 8.507059e+37 }
 0x28e   :  { %v957_v51 = vrot.slane %v956_v14, 1  ;;  %v1142_v29 = vadd.f32 %v1810_v47, %v1141_v54 }
 0x28f   :  { %v1814_v57 = vpop.eup %1813  ;;  %v961_v59 = vadd.f32 %v960_v44, %v959_v53  ;;  %1730 = vmatmul.msk.f32.gmra.mxu3 %vm92_vm0, %v2522_v39 }
 0x290   :  { %v958_v19 = vadd.f32 %v957_v51, %v956_v14  ;;  %v1146_v62 = vsel %vm1145_vm3, %v1810_v47, %v1142_v29  ;;  %v1154_v22 = vmul.f32 %v1814_v57, %v2507_v21  ;;  %vm1159_vm5 = vweird.f32 %v1814_v57 }
 0x291   :  { %v962_v63 = vrot.slane %v961_v59, 2  ;;  %v1151_v4 = vsel %vm1148_vm4, %v1150_v60, %v1146_v62  ;;  %vm1160_vm7 = vmor %vm1158_vm6, %vm1159_vm5 }
 0x292   :  { %1817 = vrcp.f32 %v958_v19  ;;  %v1155_v24 = vsub.f32 1.0, %v1154_v22  ;;  %v2531_v28 = vmul.f32 %v2444_v5, %v1151_v4  ;;  %v1165_v5 = vor.u32 1.1754944e-38, %v1164_v7 }
 0x293   :  { %v2528_v2 = vpop.eup %1815  ;;  %v963_v6 = vadd.f32 %v962_v63, %v961_v59  ;;  %v1179_v30 = vand.u32 2147483648, %v958_v19  ;;  %v1177_v34 = vand.u32 2147483647, %v958_v19  ;;  %vm1173_vm11 = vweird.f32 %v958_v19 }
 0x294   :  { %v966_v1 = vsel %vm92_vm0, %v2528_v2, 0.0  ;;  %v1156_v8 = vmul.f32 %v1814_v57, %v1155_v24  ;;  %v1241_v7 = vsel %vm1213_vm9, %v2501_v52, -inf  ;;  %v1232_v52 = vsel %vm1213_vm9, %v2420_v36, -inf }
 0x295   :  { %v964_v10 = vrot.slane %v963_v6, 1  ;;  %v967_v13 = vrot.slane %v966_v1, 4  ;;  %v1180_v37 = vor.u32 1.1754944e-38, %v1179_v30  ;;  %vm1178_vm13 = vcmp.eq.f32.partialorder %v1177_v34, 8.507059e+37 }
 0x296   :  { %v1157_v48 = vadd.f32 %v1814_v57, %v1156_v8  ;;  %v1238_v36 = vsel %vm1213_vm9, %v2486_v0, -inf }
 0x297   :  { %v965_v15 = vadd.f32 %v964_v10, %v963_v6  ;;  %v968_v23 = vadd.f32 %v967_v13, %v966_v1  ;;  %1731 = vmatmul.msk.f32.gmra.mxu3 %vm92_vm0, %v2531_v28  ;;  %v431_v6 = vpop.f32.mrf.mxu0 }
 0x298   :  { %v1818_v11 = vpop.eup %1817  ;;  %v1161_v3 = vsel %vm1160_vm7, %v1814_v57, %v1157_v48  ;;  %v1244_v48 = vsel %vm1213_vm9, %v2522_v39, -inf  ;;  %v1223_v39 = vsel %vm1213_vm9, %v2318_v56, -inf }
 0x299   :  { %1819 = vrcp.f32 %v965_v15  ;;  %v969_v12 = vrot.slane %v968_v23, 2  ;;  %v1166_v25 = vsel %vm1163_vm8, %v1165_v5, %v1161_v3  ;;  %v1169_v26 = vmul.f32 %v1818_v11, %v958_v19 }
 0x29a   :  { %v1167_v45 = vmul.f32 %v2477_v32, %v1166_v25  ;;  %vm1174_vm10 = vweird.f32 %v1818_v11  ;;  %v1194_v14 = vand.u32 2147483648, %v965_v15  ;;  %v1192_v54 = vand.u32 2147483647, %v965_v15 }
 0x29b   :  { %v970_v27 = vadd.f32 %v969_v12, %v968_v23  ;;  %v1170_v47 = vsub.f32 1.0, %v1169_v26  ;;  %vm1175_vm12 = vmor %vm1173_vm11, %vm1174_vm10  ;;  %vm1188_vm15 = vweird.f32 %v965_v15  ;;  %v1247_v23 = vsel %vm1213_vm9, %v2531_v28, -inf }
 0x29c   :  { %v1250_v21 = vsel %vm1213_vm9, %v1167_v45, -inf  ;;  %v1195_v57 = vor.u32 1.1754944e-38, %v1194_v14  ;;  %vm1193_vm2 = vcmp.eq.f32.partialorder %v1192_v54, 8.507059e+37  ;;  %v1226_v12 = vsel %vm1213_vm9, %v2353_v33, -inf }
 0x29d   :  { %v971_v58 = vrot.slane %v970_v27, 1  ;;  %1251 = vmax.xlane.f32.xlu2 %v1250_v21  ;;  %v1171_v31 = vmul.f32 %v1818_v11, %v1170_v47  ;;  %v1229_v26 = vsel %vm1213_vm9, %v2390_v49, -inf }
 0x29f   :  { %v1820_v35 = vpop.eup %1819  ;;  %v972_v38 = vadd.f32 %v971_v58, %v970_v27  ;;  %1732 = vmatmul.msk.f32.gmra.mxu3 %vm92_vm0, %v1167_v45  ;;  %v1172_v61 = vadd.f32 %v1818_v11, %v1171_v31  ;;  %v1217_v45 = vsel %vm1213_vm9, %v2253_v46, -inf  ;;  %v1220_v27 = vsel %vm1213_vm9, %v2280_v17, -inf }
 0x2a0   :  { %v1184_v32 = vmul.f32 %v1820_v35, %v965_v15  ;;  %vm1189_vm14 = vweird.f32 %v1820_v35  ;;  %v434_v15 = vpop.f32.mrf.mxu0 }
 0x2a1   :  { %1821 = vrcp.f32 %v972_v38  ;;  %v1176_v40 = vsel %vm1175_vm12, %v1818_v11, %v1172_v61  ;;  %vm1190_vm1 = vmor %vm1188_vm15, %vm1189_vm14  ;;  %v1209_v22 = vand.u32 2147483648, %v972_v38  ;;  %v1207_v24 = vand.u32 2147483647, %v972_v38 }
 0x2a2   :  { %v1181_v41 = vsel %vm1178_vm13, %v1180_v37, %v1176_v40  ;;  %v1185_v50 = vsub.f32 1.0, %v1184_v32  ;;  %vm1203_vm4 = vweird.f32 %v972_v38  ;;  %vm1607_vm12 = vcmask 523648  }
 0x2a3   :  { %v1182_v55 = vmul.f32 %v2498_v20, %v1181_v41  ;;  %v1210_v8 = vor.u32 1.1754944e-38, %v1209_v22  ;;  %vm1208_vm6 = vcmp.eq.f32.partialorder %v1207_v24, 8.507059e+37  ;;  %v179_v22 = vld [vmem:[#allocation2 + $0x168] sm:$0xff] }
 0x2a4   :  { %v1186_v53 = vmul.f32 %v1820_v35, %v1185_v50 }
 0x2a5   :  { %v1253_v44 = vsel %vm1213_vm9, %v1182_v55, -inf }
 0x2a6   :  { %1254 = vmax.xlane.f32.xlu0 %v1253_v44  ;;  %v1187_v51 = vadd.f32 %v1820_v35, %v1186_v53 }
 0x2a7   :  { %v1822_v29 = vpop.eup %1821  ;;  %1733 = vmatmul.msk.f32.gmra.mxu3 %vm92_vm0, %v1182_v55 }
 0x2a8   :  { %v1191_v59 = vsel %vm1190_vm1, %v1820_v35, %v1187_v51  ;;  %v1199_v60 = vmul.f32 %v1822_v29, %v972_v38  ;;  %vm1204_vm3 = vweird.f32 %v1822_v29  ;;  %v437_v11 = vpop.f32.mrf.mxu0 }
 0x2a9   :  { %v1196_v19 = vsel %vm1193_vm2, %v1195_v57, %v1191_v59  ;;  %vm1205_vm5 = vmor %vm1203_vm4, %vm1204_vm3  ;;  %vm1618_vm2 = vcmask 1048064  }
 0x2aa   :  { %v1197_v20 = vmul.f32 %v2516_v43, %v1196_v19  ;;  %v1200_v62 = vsub.f32 1.0, %v1199_v60  ;;  %v181_v60 = vld [vmem:[#allocation2 + $0x178] sm:$0xff]  ;;  %v180_v19 = vld [vmem:[#allocation2 + $0x170] sm:$0xff] }
 0x2ac   :  { %v1256_v63 = vsel %vm1213_vm9, %v1197_v20, -inf  ;;  %v1201_v4 = vmul.f32 %v1822_v29, %v1200_v62 }
 0x2ad   :  { %1257 = vmax.xlane.f32.xlu2 %v1256_v63 }
 0x2ae   :  { %1242 = vmax.xlane.f32.xlu0 %v1241_v7  ;;  %v1202_v1 = vadd.f32 %v1822_v29, %v1201_v4 }
 0x2af   :  { %1734 = vmatmul.msk.f32.gmra.mxu3 %vm92_vm0, %v1197_v20 }
 0x2b0   :  { %v1206_v43 = vsel %vm1205_vm5, %v1822_v29, %v1202_v1  ;;  %v440_v56 = vpop.f32.mrf.mxu0 }
 0x2b1   :  { %v1211_v9 = vsel %vm1208_vm6, %v1210_v8, %v1206_v43  ;;  %v177_v43 = vld [vmem:[#allocation2 + $0x158] sm:$0xff] }
 0x2b2   :  { %v1212_v10 = vmul.f32 %v2528_v2, %v1211_v9  ;;  %v1235_v2 = vsel %vm1213_vm9, %v2454_v16, -inf  ;;  %v1214_v16 = vsel %vm1213_vm9, %v2233_v18, -inf }
 0x2b4   :  { %v1259_v13 = vsel %vm1213_vm9, %v1212_v10, -inf }
 0x2b5   :  { %1260 = vmax.xlane.f32.xlu1 %v1259_v13  ;;  %1245 = vmax.xlane.f32.xlu2 %v1244_v48 }
 0x2b6   :  { %1233 = vmax.xlane.f32.xlu0 %v1232_v52  ;;  %v175_v52 = vld [vmem:[#allocation2 + $0x148] sm:$0xff] }
 0x2b7   :  { %1735 = vmatmul.msk.f32.gmra.mxu3 %vm92_vm0, %v1212_v10  ;;  %v176_v10 = vld [vmem:[#allocation2 + $0x150] sm:$0xff] }
 0x2b8   :  { %v443_v18 = vpop.f32.mrf.mxu0 }
 0x2bd   :  { %1248 = vmax.xlane.f32.xlu1 %v1247_v23  ;;  %1236 = vmax.xlane.f32.xlu2 %v1235_v2 }
 0x2be   :  { %1224 = vmax.xlane.f32.xlu0 %v1223_v39 }
 0x2c0   :  { %v1366_v5 = vpop.f32.mrf.mxu3  ;;  %v446_v30 = vpop.f32.mrf.mxu0 }
 0x2c1   :  { %v2564_v3 = vmul.f32 %v1366_v5, %v428_v42 }
 0x2c5   :  { %1239 = vmax.xlane.f32.xlu1 %v1238_v36  ;;  %1227 = vmax.xlane.f32.xlu2 %v1226_v12  ;;  %v173_v36 = vld [vmem:[#allocation2 + $0x138] sm:$0xff] }
 0x2c6   :  { %1215 = vmax.xlane.f32.xlu0 %v1214_v16 }
 0x2c8   :  { %v1369_v28 = vpop.f32.mrf.mxu3  ;;  %v449_v49 = vpop.f32.mrf.mxu0 }
 0x2c9   :  { %v2572_v25 = vmul.f32 %v1369_v28, %v431_v6  ;;  %v178_v6 = vld [vmem:[#allocation2 + $0x160] sm:$0xff] }
 0x2cd   :  { %1230 = vmax.xlane.f32.xlu1 %v1229_v26  ;;  %1218 = vmax.xlane.f32.xlu2 %v1217_v45 }
 0x2d0   :  { %v1372_v0 = vpop.f32.mrf.mxu3  ;;  %v452_v38 = vpop.f32.mrf.mxu0 }
 0x2d1   :  { %v2578_v33 = vmul.f32 %v1372_v0, %v434_v15 }
 0x2d5   :  { %1221 = vmax.xlane.f32.xlu1 %v1220_v27 }
 0x2d8   :  { %v2592_v17 = vpop.f32.mrf.mxu0 }
 0x2d9   :  { %v1375_v47 = vpop.f32.mrf.mxu3 }
 0x2da   :  { %v2582_v21 = vmul.f32 %v1375_v47, %v437_v11  ;;  %v174_v11 = vld [vmem:[#allocation2 + $0x140] sm:$0xff] }
 0x2e0   :  { %v2596_v50 = vpop.f32.mrf.mxu0 }
 0x2e2   :  { %v1378_v58 = vpop.f32.mrf.mxu3 }
 0x2e3   :  { %v2584_v31 = vmul.f32 %v1378_v58, %v440_v56  ;;  %v172_v56 = vld [vmem:[#allocation2 + $0x130] sm:$0xff] }
 0x2e8   :  { %v2600_v55 = vpop.f32.mrf.mxu0 }
 0x2ea   :  { %v1381_v34 = vpop.f32.mrf.mxu3 }
 0x2eb   :  { %v2586_v46 = vmul.f32 %v1381_v34, %v443_v18  ;;  %v170_v34 = vld [vmem:[#allocation2 + $0x120] sm:$0xff] }
 0x2f0   :  { %v464_v44 = vpop.f32.mrf.mxu0 }
 0x2f2   :  { %v1384_v35 = vpop.f32.mrf.mxu3 }
 0x2f3   :  { %v2588_v61 = vmul.f32 %v1384_v35, %v446_v30  ;;  %v171_v30 = vld [vmem:[#allocation2 + $0x128] sm:$0xff] }
 0x2f8   :  { %v467_v59 = vpop.f32.mrf.mxu0 }
 0x2fa   :  { %v1387_v37 = vpop.f32.mrf.mxu3 }
 0x2fb   :  { %v2590_v32 = vmul.f32 %v1387_v37, %v449_v49 }
 0x300   :  { %v470_v8 = vpop.f32.mrf.mxu0 }
 0x302   :  { %v1390_v40 = vpop.f32.mrf.mxu3 }
 0x303   :  { %v2594_v41 = vmul.f32 %v1390_v40, %v452_v38  ;;  %v169_v40 = vld [vmem:[#allocation2 + $0x118] sm:$0xff] }
 0x308   :  { %v473_v12 = vpop.f32.mrf.mxu0 }
 0x30a   :  { %v2598_v42 = vpop.f32.mrf.mxu3 }
 0x310   :  { %v1252_v53 = vpop.xlane.xlu2 %1251 }
 0x311   :  { %v1274_v9 = vmul.f32 %v1252_v53, %v178_v6 }
 0x312   :  { %v2602_v14 = vpop.f32.mrf.mxu3 }
 0x319   :  { %v1255_v29 = vpop.xlane.xlu0 %1254 }
 0x31a   :  { %v1399_v54 = vpop.f32.mrf.mxu3  ;;  %v1275_v1 = vmul.f32 %v1255_v29, %v179_v22  ;;  %v1424_v29 = vmul.f32 %v2602_v14, %v2596_v50 }
 0x31b   :  { %v1425_v53 = vmul.f32 %v1399_v54, %v2600_v55  ;;  %v166_v54 = vld [vmem:[#allocation2 + $0x100] sm:$0xff] }
 0x320   :  { %v1258_v51 = vpop.xlane.xlu2 %1257 }
 0x321   :  { %v1276_v24 = vmul.f32 %v1258_v51, %v180_v19  ;;  %v1243_v7 = vpop.xlane.xlu0 %1242  ;;  %v1423_v19 = vmul.f32 %v2598_v42, %v2592_v17  ;;  %v182_v17 = vld [vmem:[%s2723_s3] sm:$0xff] }
 0x322   :  { %v1402_v57 = vpop.f32.mrf.mxu3  ;;  %v1271_v39 = vmul.f32 %v1243_v7, %v175_v52  ;;  %v1755_v7 = vld [vmem:[%s2726_s6 + $0x2] ss:$0 sm:$0xff]  ;;  %v1834_v52 = vld [vmem:[%s2720_s0 + $0x8] sm:$0xff] }
 0x323   :  { %v1426_v38 = vmul.f32 %v1402_v57, %v464_v44  ;;  %v167_v44 = vld [vmem:[#allocation2 + $0x108] sm:$0xff] }
 0x328   :  { %v1261_v20 = vpop.xlane.xlu1 %1260  ;;  %v1246_v4 = vpop.xlane.xlu2 %1245 }
 0x329   :  { %v1277_v62 = vmul.f32 %v1261_v20, %v181_v60  ;;  %v1272_v23 = vmul.f32 %v1246_v4, %v176_v10  ;;  %v1234_v5 = vpop.xlane.xlu0 %1233 }
 0x32a   :  { %v1405_v63 = vpop.f32.mrf.mxu3  ;;  %v1268_v27 = vmul.f32 %v1234_v5, %v172_v56 }
 0x32b   :  { %1278 = vmatpush.msra.mxu2 %v1277_v62  ;;  %v1427_v58 = vmul.f32 %v1405_v63, %v467_v59  ;;  %v168_v59 = vld [vmem:[#allocation2 + $0x110] sm:$0xff] }
 0x32d   :  { %1279 = vmatpush.msra.mxu2 %v1276_v24 }
 0x32f   :  { %1280 = vmatpush.msra.mxu2 %v1275_v1 }
 0x330   :  { %v1249_v13 = vpop.xlane.xlu1 %1248  ;;  %v1237_v2 = vpop.xlane.xlu2 %1236 }
 0x331   :  { %v1273_v48 = vmul.f32 %v1249_v13, %v177_v43  ;;  %1281 = vmatpush.msra.mxu2 %v1274_v9  ;;  %v1269_v45 = vmul.f32 %v1237_v2, %v173_v36  ;;  %v1225_v49 = vpop.xlane.xlu0 %1224  ;;  %v1833_v43 = vld [vmem:[%s2720_s0] sm:$0xff]  ;;  %v1866_v2 = vmov 48.0  }
 0x332   :  { %v1408_v15 = vpop.f32.mrf.mxu3  ;;  %v1265_v60 = vmul.f32 %v1225_v49, %v169_v40  ;;  %1823 = vrcp.f32 %v1866_v2  ;;  %v1539_v49 = vld [vmem:[%s2725_s5 + $0x20] sm:$0xff] }
 0x333   :  { %1282 = vmatpush.msra.mxu2 %v1273_v48  ;;  %v1428_v18 = vmul.f32 %v1408_v15, %v470_v8 }
 0x335   :  { %1283 = vmatpush.msra.mxu2 %v1272_v23 }
 0x337   :  { %1284 = vmatpush.msra.mxu2 %v1271_v39 }
 0x338   :  { %v1240_v16 = vpop.xlane.xlu1 %1239  ;;  %v1228_v47 = vpop.xlane.xlu2 %1227 }
 0x339   :  { %v1270_v28 = vmul.f32 %v1240_v16, %v174_v11  ;;  %v1266_v51 = vmul.f32 %v1228_v47, %v170_v34  ;;  %v1216_v62 = vpop.xlane.xlu0 %1215  ;;  %v1824_v39 = vpop.eup %1823  ;;  %v1540_v34 = vld [vmem:[%s2725_s5 + $0x28] sm:$0xff] }
 0x33a   :  { %v1411_v26 = vpop.f32.mrf.mxu3  ;;  %v1262_v50 = vmul.f32 %v1216_v62, %v166_v54  ;;  %v1484_v5 = vmul.f32 48.0, %v1824_v39  ;;  %vm1488_vm7 = vweird.f32 %v1824_v39 }
 0x33b   :  { %v1429_v0 = vmul.f32 %v1411_v26, %v473_v12  ;;  %1285 = vmatpush.msra.mxu2 %v1270_v28 }
 0x33c   :  { %v1485_v11 = vsub.f32 1.0, %v1484_v5 }
 0x33d   :  { %1430 = vmatpush.msra.mxu0 %v1429_v0  ;;  %1286 = vmatpush.msra.mxu2 %v1269_v45 }
 0x33e   :  { %v1486_v36 = vmul.f32 %v1824_v39, %v1485_v11 }
 0x33f   :  { %1431 = vmatpush.msra.mxu0 %v1428_v18  ;;  %1287 = vmatpush.msra.mxu2 %v1268_v27 }
 0x340   :  { %v1231_v35 = vpop.xlane.xlu1 %1230  ;;  %v1219_v57 = vpop.xlane.xlu2 %1218  ;;  %v1487_v12 = vadd.f32 %v1824_v39, %v1486_v36 }
 0x341   :  { %1432 = vmatpush.msra.mxu0 %v1427_v58  ;;  %v1267_v37 = vmul.f32 %v1231_v35, %v171_v30  ;;  %v1263_v22 = vmul.f32 %v1219_v57, %v167_v44  ;;  %v1543_v35 = vpack.c.bf16 %v1540_v34, %v1539_v49 }
 0x342   :  { %v1489_v16 = vsel %vm1488_vm7, %v1824_v39, %v1487_v12 }
 0x343   :  { %1433 = vmatpush.msra.mxu0 %v1426_v38  ;;  %1288 = vmatpush.msra.mxu2 %v1267_v37 }
 0x344   :  { %1553 = vmatpush.bf16.msrb.mxu1 %v1543_v35 }
 0x345   :  { %1434 = vmatpush.msra.mxu0 %v1425_v53  ;;  %1289 = vmatpush.msra.mxu2 %v1266_v51  ;;  %v1537_v53 = vld [vmem:[%s2725_s5 + $0x10] sm:$0xff]  ;;  %v1538_v51 = vld [vmem:[%s2725_s5 + $0x18] sm:$0xff] }
 0x347   :  { %1435 = vmatpush.msra.mxu0 %v1424_v29  ;;  %1290 = vmatpush.msra.mxu2 %v1265_v60  ;;  %v1535_v29 = vld [vmem:[%s2725_s5] sm:$0xff]  ;;  %v1542_v60 = vpack.c.bf16 %v1538_v51, %v1537_v53 }
 0x348   :  { %v1222_v20 = vpop.xlane.xlu1 %1221 }
 0x349   :  { %1436 = vmatpush.msra.mxu0 %v1423_v19  ;;  %v1264_v55 = vmul.f32 %v1222_v20, %v168_v59  ;;  %v1536_v59 = vld [vmem:[%s2725_s5 + $0x8] sm:$0xff]  ;;  %1554 = vmatpush.bf16.msrb.mxu1 %v1542_v60 }
 0x34a   :  { %v1541_v57 = vpack.c.bf16 %v1536_v59, %v1535_v29  ;;  %v1868_v59 = vmov 0.0  }
 0x34b   :  { %1437 = vmatpush.msra.mxu0 %v2594_v41  ;;  %1291 = vmatpush.msra.mxu2 %v1264_v55  ;;  %v1637_v41 = vld [vmem:[%s2724_s4 + $0x68] sm:$0xff] }
 0x34d   :  { %1438 = vmatpush.msra.mxu0 %v2590_v32  ;;  %1292 = vmatpush.msra.mxu2 %v1263_v22  ;;  %v183_v32 = vld [vmem:[%s2723_s3 + $0x8] sm:$0xff] }
 0x34e   :  { %1555 = vmatpush.bf16.msrb.mxu1 %v1541_v57 }
 0x34f   :  { %1439 = vmatpush.msra.mxu0 %v2588_v61  ;;  %1293 = vmatpush.msra.mxu2 %v1262_v50  ;;  %v1636_v61 = vld [vmem:[%s2724_s4 + $0x60] sm:$0xff] }
 0x350   :  { %1294 = vmatmul.f32.vlgmr.msra.gmra.mxu2 %v182_v17  ;;  %v1454_v42 = vpack.c.bf16 %v1637_v41, %v1636_v61 }
 0x351   :  { %1440 = vmatpush.msra.mxu0 %v2586_v46  ;;  %v1640_v46 = vld [vmem:[%s2724_s4 + $0x80] sm:$0xff] }
 0x353   :  { %1441 = vmatpush.msra.mxu0 %v2584_v31 }
 0x355   :  { %1442 = vmatpush.msra.mxu0 %v2582_v21  ;;  %v1641_v21 = vld [vmem:[%s2724_s4 + $0x88] sm:$0xff] }
 0x356   :  { %v1456_v31 = vpack.c.bf16 %v1641_v21, %v1640_v46  ;;  %v1756_v21 = vld [vmem:[%s2726_s6 + $0x3] ss:$0 sm:$0xff] }
 0x357   :  { %1443 = vmatpush.msra.mxu0 %v2578_v33  ;;  %v1638_v33 = vld [vmem:[%s2724_s4 + $0x70] sm:$0xff] }
 0x358   :  { %1297 = vmatmul.f32.gmra.mxu2 %v183_v32 }
 0x359   :  { %1444 = vmatpush.msra.mxu0 %v2572_v25  ;;  %v1639_v25 = vld [vmem:[%s2724_s4 + $0x78] sm:$0xff]  ;;  %1466 = vmatpush.bf16.msrb.mxu2 %v1456_v31  ;;  %s1867_s4 = smov 64  }
 0x35b   :  { %1445 = vmatpush.msra.mxu0 %v2564_v3  ;;  %v1455_v3 = vpack.c.bf16 %v1639_v25, %v1638_v33  ;;  %v1757_v25 = vld [vmem:[%s2726_s6 + $0x4] ss:$0 sm:$0xff] }
 0x35c   :  { %1446 = vmatmul.f32.vlgmr.msra.gmra.mxu0 %v182_v17 }
 0x35d   :  { %1467 = vmatpush.bf16.msrb.mxu2 %v1455_v3 }
 0x361   :  { %1468 = vmatpush.bf16.msrb.mxu2 %v1454_v42 }
 0x364   :  { %1449 = vmatmul.f32.gmra.mxu0 %v183_v32 }
 0x3d3   :  { %v1295_v24 = vpop.f32.mrf.mxu2 }
 0x3d9   :  { %v1447_v14 = vpop.f32.mrf.mxu0 }
 0x3db   :  { %v1298_v6 = vpop.f32.mrf.mxu2 }
 0x3e1   :  { %v1450_v63 = vpop.f32.mrf.mxu0 }
 0x3e2   :  { %v1453_v4 = vpack.c.bf16 %v1450_v63, %v1447_v14 }
 0x3e4   :  { %1736 = vmatmul.msk.bf16.vlgmr.msrb.gmra.mxu2 %vm92_vm0, %v1453_v4 }
 0x467   :  { %v1470_v1 = vpop.f32.mrf.mxu2 }
 0x468   :  { %v1471_v8 = vadd.f32 %v1755_v7, %v1470_v1 }
 0x46a   :  { %v1475_v9 = vadd.f32 %v1833_v43, %v1471_v8 }
 0x46c   :  { %v1477_v10 = vsel %vm92_vm0, %v1475_v9, 0.0 }
 0x46d   :  { %1478 = vadd.xlane.f32.xlu1 %v1477_v10 }
 0x46f   :  { %v1472_v13 = vpop.f32.mrf.mxu2 }
 0x470   :  { %v1473_v48 = vadd.f32 %v1755_v7, %v1472_v13 }
 0x472   :  { %v1476_v15 = vadd.f32 %v1834_v52, %v1473_v48 }
 0x474   :  { %v1480_v23 = vsel %vm92_vm0, %v1476_v15, 0.0 }
 0x475   :  { %1481 = vadd.xlane.f32.xlu2 %v1480_v23 }
 0x48d   :  { %1601 = vrot.lane.b32.xlu2 %v1295_v24, %s1865_s21 }
 0x4e0   :  { %v1479_v28 = vpop.xlane.xlu1 %1478 }
 0x4e1   :  { %v1490_v56 = vmul.f32 %v1489_v16, %v1479_v28 }
 0x4e3   :  { %v1492_v26 = vsub.f32 %v1475_v9, %v1490_v56  ;;  %v1758_v9 = vld [vmem:[%s2726_s6 + $0x5] ss:$0 sm:$0xff] }
 0x4e5   :  { %v1494_v45 = vmul.f32 %v1492_v26, %v1492_v26 }
 0x4e7   :  { %v1496_v0 = vsel %vm92_vm0, %v1494_v45, 0.0 }
 0x4e8   :  { %v1482_v27 = vpop.xlane.xlu2 %1481  ;;  %1497 = vadd.xlane.f32.xlu0 %v1496_v0 }
 0x4e9   :  { %v1491_v18 = vmul.f32 %v1489_v16, %v1482_v27 }
 0x4eb   :  { %v1493_v47 = vsub.f32 %v1476_v15, %v1491_v18 }
 0x4ed   :  { %v1495_v30 = vmul.f32 %v1493_v47, %v1493_v47 }
 0x4ef   :  { %v1499_v58 = vsel %vm92_vm0, %v1495_v30, 0.0 }
 0x4f0   :  { %1500 = vadd.xlane.f32.xlu1 %v1499_v58  ;;  %v1602_v4 = vpop.permute.xlu2 %1601 }
 0x4fc   :  { %1603 = vrot.lane.b32.xlu0 %v1298_v6, %s1865_s21 }
 0x55b   :  { %v1498_v38 = vpop.xlane.xlu0 %1497 }
 0x55c   :  { %v1502_v37 = vmul.f32 %v1498_v38, %v1489_v16 }
 0x55e   :  { %v1504_v40 = vadd.f32 1e-12, %v1502_v37 }
 0x560   :  { %1825 = vrsqrt.f32 %v1504_v40  ;;  %vm1512_vm9 = vweird.f32 %v1504_v40 }
 0x563   :  { %v1501_v19 = vpop.xlane.xlu1 %1500 }
 0x564   :  { %v1503_v44 = vmul.f32 %v1501_v19, %v1489_v16 }
 0x566   :  { %v1826_v20 = vpop.eup %1825  ;;  %v1505_v55 = vadd.f32 1e-12, %v1503_v44 }
 0x567   :  { %v1507_v54 = vmul.f32 %v1826_v20, %v1504_v40  ;;  %vm1513_vm8 = vweird.f32 %v1826_v20 }
 0x568   :  { %1827 = vrsqrt.f32 %v1505_v55  ;;  %vm1514_vm10 = vmor %vm1512_vm9, %vm1513_vm8  ;;  %vm1522_vm13 = vweird.f32 %v1505_v55 }
 0x569   :  { %v1508_v62 = vmul.f32 %v1826_v20, %v1507_v54 }
 0x56b   :  { %v1509_v22 = vmul.f32 0.5, %v1508_v62 }
 0x56d   :  { %v1510_v50 = vsub.f32 1.5, %v1509_v22 }
 0x56e   :  { %v1828_v17 = vpop.eup %1827  ;;  %v1604_v8 = vpop.permute.xlu0 %1603 }
 0x56f   :  { %v1511_v32 = vmul.f32 %v1826_v20, %v1510_v50  ;;  %v1517_v46 = vmul.f32 %v1828_v17, %v1505_v55  ;;  %vm1523_vm11 = vweird.f32 %v1828_v17 }
 0x570   :  { %vm1524_vm14 = vmor %vm1522_vm13, %vm1523_vm11 }
 0x571   :  { %v1515_v33 = vsel %vm1514_vm10, %v1826_v20, %v1511_v32  ;;  %v1518_v31 = vmul.f32 %v1828_v17, %v1517_v46 }
 0x572   :  { %v1526_v3 = vmul.f32 %v1515_v33, %v1492_v26 }
 0x573   :  { %v1519_v61 = vmul.f32 0.5, %v1518_v31 }
 0x574   :  { %v1529_v41 = vmul.f32 %v1756_v21, %v1526_v3 }
 0x575   :  { %v1520_v42 = vsub.f32 1.5, %v1519_v61 }
 0x576   :  { %v1532_v14 = vadd.f32 %v1757_v25, %v1529_v41 }
 0x577   :  { %v1521_v63 = vmul.f32 %v1828_v17, %v1520_v42 }
 0x578   :  { %1597 = vst.msk [vmem:[%s2727_s7] sm:$0xff] %vm92_vm0, %v1532_v14 }
 0x579   :  { %v1525_v24 = vsel %vm1524_vm14, %v1828_v17, %v1521_v63  ;;  %1608 = vst.msk [vmem:[%s2727_s7] sm:$0xff] %vm1607_vm12, %v1602_v4 }
 0x57a   :  { %v1527_v6 = vmul.f32 %v1525_v24, %v1493_v47 }
 0x57c   :  { %v1530_v7 = vmul.f32 %v1756_v21, %v1527_v6 }
 0x57e   :  { %v1533_v1 = vadd.f32 %v1757_v25, %v1530_v7 }
 0x580   :  { %1598 = vst.msk [vmem:[%s2727_s7 + $0x10] sm:$0xff] %vm92_vm0, %v1533_v1  ;;  %v1534_v43 = vpack.c.bf16 %v1533_v1, %v1532_v14 }
 0x581   :  { %1609 = vst.msk [vmem:[%s2727_s7 + $0x10] sm:$0xff] %vm1607_vm12, %v1604_v8 }
 0x582   :  { %1737 = vmatmul.msk.bf16.vlgmr.msrb.gmra.mxu1 %vm92_vm0, %v1534_v43  ;;  %vm1582_vm0 = vcmask 523264  }
 0x5ff   :  { %v1557_v10 = vpop.f32.mrf.mxu1 }
 0x600   :  { %v1558_v13 = vadd.f32 %v1758_v9, %v1557_v10 }
 0x602   :  { %v1562_v48 = vmax.f32 %v1558_v13, 0.0  ;;  %1612 = vrot.lane.b32.xlu1 %v1558_v13, %s1867_s4 }
 0x604   :  { %v1564_v52 = vadd.f32 1.0, %v1562_v48  ;;  %v1567_v15 = vmul.f32 -0.5, %v1562_v48  ;;  %v1570_v5 = vand.u32 2147483647, %v1562_v48 }
 0x606   :  { %1829 = vlog2.f32 %v1564_v52  ;;  %v1568_v39 = vadd.f32 1.0, %v1567_v15  ;;  %vm1571_vm15 = vcmp.lt.f32.partialorder %v1570_v5, 0.0004427343 }
 0x607   :  { %v1559_v23 = vpop.f32.mrf.mxu1 }
 0x608   :  { %v1560_v2 = vadd.f32 %v1758_v9, %v1559_v23  ;;  %v1569_v28 = vmul.f32 %v1568_v39, %v1562_v48 }
 0x60a   :  { %v1563_v11 = vmax.f32 %v1560_v2, 0.0  ;;  %1614 = vrot.lane.b32.xlu0 %v1560_v2, %s1867_s4 }
 0x60c   :  { %v1830_v36 = vpop.eup %1829  ;;  %v1573_v12 = vadd.f32 1.0, %v1563_v11  ;;  %v1576_v56 = vmul.f32 -0.5, %v1563_v11  ;;  %v1579_v18 = vand.u32 2147483647, %v1563_v11 }
 0x60d   :  { %v1566_v16 = vmul.f32 0.6931472, %v1830_v36 }
 0x60e   :  { %1831 = vlog2.f32 %v1573_v12  ;;  %v1577_v27 = vadd.f32 1.0, %v1576_v56  ;;  %vm1580_vm1 = vcmp.lt.f32.partialorder %v1579_v18, 0.0004427343 }
 0x60f   :  { %v1572_v26 = vsel %vm1571_vm15, %v1569_v28, %v1566_v16 }
 0x610   :  { %v1583_v45 = vsel %vm1582_vm0, %v1572_v26, -inf  ;;  %v1578_v34 = vmul.f32 %v1577_v27, %v1563_v11 }
 0x611   :  { %v1584_v0 = vrot.slane %v1583_v45, 4 }
 0x613   :  { %v1585_v47 = vmax.f32 %v1583_v45, %v1584_v0 }
 0x614   :  { %v1832_v30 = vpop.eup %1831 }
 0x615   :  { %v1586_v58 = vrot.slane %v1585_v47, 2  ;;  %v1575_v49 = vmul.f32 0.6931472, %v1832_v30 }
 0x617   :  { %v1587_v35 = vmax.f32 %v1585_v47, %v1586_v58  ;;  %v1581_v38 = vsel %vm1580_vm1, %v1578_v34, %v1575_v49 }
 0x618   :  { %v1590_v37 = vsel %vm1582_vm0, %v1581_v38, -inf }
 0x619   :  { %v1588_v40 = vrot.slane %v1587_v35, 1  ;;  %v1591_v53 = vrot.slane %v1590_v37, 4 }
 0x61b   :  { %v1589_v51 = vmax.f32 %v1587_v35, %v1588_v40  ;;  %v1592_v29 = vmax.f32 %v1590_v37, %v1591_v53 }
 0x61d   :  { %1621 = vst.msk [vmem:[%s2727_s7 + $0x8] sm:$0xff] %vm1582_vm0, %v1589_v51  ;;  %v1593_v60 = vrot.slane %v1592_v29, 2 }
 0x61e   :  { %1623 = vst.msk [vmem:[%s2727_s7 + $0x8] sm:$0xff] %vm1618_vm2, %v1868_v59 }
 0x61f   :  { %v1594_v19 = vmax.f32 %v1592_v29, %v1593_v60 }
 0x621   :  { %v1595_v44 = vrot.slane %v1594_v19, 1 }
 0x623   :  { %v1596_v57 = vmax.f32 %v1594_v19, %v1595_v44 }
 0x625   :  { %1622 = vst.msk [vmem:[%s2727_s7 + $0x18] sm:$0xff] %vm1582_vm0, %v1596_v57 }
 0x626   :  { %1624 = vst.msk [vmem:[%s2727_s7 + $0x18] sm:$0xff] %vm1618_vm2, %v1868_v59 }
 0x674   :  { %v1613_v20 = vpop.permute.xlu1 %1612 }
 0x675   :  { %1619 = vst.msk [vmem:[%s2727_s7] sm:$0xff] %vm1618_vm2, %v1613_v20 }
 0x67c   :  { %v1615_v55 = vpop.permute.xlu0 %1614 }
 0x67d   :  { %1620 = vst.msk [vmem:[%s2727_s7 + $0x10] sm:$0xff] %vm1618_vm2, %v1615_v55 }
 0x67e   :  { %1629 = vsyncpa [#allocation3], 1 }

</bundles_post_ra>
